<compile_context>
chip_gen: v7x
topology: tpu7x:2x2x1
jax: 0.10.0
libtpu: 0.0.40
codegen_flags: <defaults>
</compile_context>

<pallas_src>
import functools

import numpy as np
import jax
import jax.numpy as jnp
from jax import lax
from jax.experimental import pallas as pl
from jax.experimental.pallas import tpu as pltpu

# ------------------------- configuration (args / fm) -------------------------
WORD_DIMS = 16
TAG_DIMS = 16
LSTM_UNITS = 32                  # H
HIDDEN_UNITS = 64
TOTAL_WORDS = 50
TOTAL_TAGS = 12
TOTAL_LABEL_ACTIONS = 4
SEQ_LEN = 8
SINGLE_SPAN = 4 * LSTM_UNITS     # = 128 (fwd diff 2H + back diff 2H)
STRUCT_SPANS = 4
LABEL_SPANS = 3


def _vmem():
    return pl.BlockSpec(memory_space=pltpu.MemorySpace.VMEM)


def _smem():
    return pl.BlockSpec(memory_space=pltpu.MemorySpace.SMEM)


# ------------------------------- Pallas kernels -------------------------------
def _encoder_kernel(embs_cat_ref, slab1_ref, slab2_ref, out_ref, st_ref, *, H):
    """Fused 2-layer bidirectional LSTM encoder (one pallas_call, no grid).

    embs_cat: (S, 2D) = [embs | embs_reversed] (reversal done in plain JAX, free).
    slabL (rows): [ W_sel (2*in, 8H) ; whh (2H, 8H) ; bias (1, 8H) ].
      W_sel rows [0:in]   -> fw gate columns only   (applied to the un-reversed input half)
      W_sel rows [in:2in] -> bw gate columns only   (applied to the reversed input half)
      so  gx_sel = x_cat @ W_sel + b  already holds, per row t,
      [fw gates of x[t] | bw gates of x[S-1-t]]  — no per-step select needed.
    Gate column order (width H each, fw/bw interleaved): [i_f i_b f_f f_b o_f o_b g_f g_b].
    whh is block-diagonal over directions (h = [h_fw | h_bw]).
    st_ref scratch (S, 4H): [fw1 | bw1 | fw1_rev | bw1_rev]  (time-ordered / reversed).
    out_ref (S, 4H): [fw1 | fw2 | bw1 | bw2]  == [fwd(2H) | back(2H)].
    """
    S = embs_cat_ref.shape[0]
    D2 = embs_cat_ref.shape[1]                    # 2 * input_dim of layer 1

    def lstm_pass(gx_sel, whh, store):
        h = jnp.zeros((1, 2 * H), jnp.float32)    # [h_fw | h_bw]
        c = jnp.zeros((1, 2 * H), jnp.float32)
        for t in range(S):                        # fully unrolled serial recurrence
            gates = gx_sel[t:t + 1, :] + jnp.dot(h, whh,
                                                 preferred_element_type=jnp.float32)
            sig = jax.nn.sigmoid(gates[:, 0:6 * H])      # i, f, o in one EUP group
            i = sig[:, 0:2 * H]
            f = sig[:, 2 * H:4 * H]
            o = sig[:, 4 * H:6 * H]
            g = jnp.tanh(gates[:, 6 * H:8 * H])
            c = f * c + i * g
            h = o * jnp.tanh(c)
            store(t, h)

    # ----------------------------- layer 1 -----------------------------
    w1_sel = slab1_ref[0:D2, :]
    whh1 = slab1_ref[D2:D2 + 2 * H, :]
    b1 = slab1_ref[D2 + 2 * H:D2 + 2 * H + 1, :]
    gx1 = jnp.dot(embs_cat_ref[...], w1_sel, preferred_element_type=jnp.float32) + b1

    def store1(t, h):
        hf = h[:, 0:H]                        # fw1 value at position t
        hb = h[:, H:2 * H]                    # bw1 value at position S-1-t
        st_ref[t:t + 1, 0:H] = hf             # fw1, time-ordered
        st_ref[S - 1 - t:S - t, H:2 * H] = hb      # bw1, time-ordered
        st_ref[S - 1 - t:S - t, 2 * H:3 * H] = hf  # fw1, reversed
        st_ref[t:t + 1, 3 * H:4 * H] = hb          # bw1, reversed

    lstm_pass(gx1, whh1, store1)

    # TODO(synk): self.dropout(state_layer1) between layers (train mode only) omitted.

    # ----------------------------- layer 2 -----------------------------
    w2_sel = slab2_ref[0:4 * H, :]
    whh2 = slab2_ref[4 * H:6 * H, :]
    b2 = slab2_ref[6 * H:6 * H + 1, :]
    st_cat = st_ref[...]                      # (S, 4H) = [state1 | state1_reversed]
    gx2 = jnp.dot(st_cat, w2_sel, preferred_element_type=jnp.float32) + b2

    def store2(t, h):
        out_ref[t:t + 1, H:2 * H] = h[:, 0:H]              # fw2, time-ordered
        out_ref[S - 1 - t:S - t, 3 * H:4 * H] = h[:, H:2 * H]  # bw2, time-ordered

    lstm_pass(gx2, whh2, store2)

    # fw1 / bw1 into the output slab (two bulk region copies, no lane concat)
    out_ref[:, 0:H] = st_ref[:, 0:H]
    out_ref[:, 2 * H:3 * H] = st_ref[:, H:2 * H]


def _score2_kernel(lr_s_ref, lr_l_ref, enc_ref,
                   ws1_ref, bs1_ref, ws2_ref, bs2_ref,
                   wl1_ref, bl1_ref, wl2_ref, bl2_ref,
                   out_s_ref, out_l_ref, xs_ref, xl_ref,
                   *, ns, s_spans, nl, l_spans):
    """Fused batched evaluate_action for BOTH heads (struct_nn + label_nn) in one call.

    enc: (S, 4H) slab [fwd(2H) | back(2H)].  lr_*: 1-D SMEM int32 [lefts... , rights...].
    Span features are written to VMEM scratch at static 128-lane offsets, then
    Linear -> ReLU -> Linear on the MXU for each head.
    w1 rows are pre-permuted so the feature layout is [fwd_0 back_0 fwd_1 back_1 ...].
    """
    S = enc_ref.shape[0]
    F2 = enc_ref.shape[1]                 # 4H (=128)
    HALF = F2 // 2                        # 2H
    lane = lax.broadcasted_iota(jnp.int32, (1, F2), 1)
    fwd_mask = lane < HALF

    def gather(lr_ref, n_rows, n_spans, x_ref):
        for n in range(n_rows):
            for k in range(n_spans):
                l = lr_ref[n * n_spans + k]
                r = lr_ref[n_rows * n_spans + n * n_spans + k]
                lm1 = jnp.where(l == 0, S - 1, l - 1)   # torch negative-index wrap fwd[left-1]
                rp1 = jnp.minimum(r + 1, S - 1)         # clamp (wrapper asserts r+1 <= S-1)
                d_f = enc_ref[pl.ds(r, 1), :] - enc_ref[pl.ds(lm1, 1), :]   # fwd diff, lanes [:2H]
                d_b = enc_ref[pl.ds(l, 1), :] - enc_ref[pl.ds(rp1, 1), :]   # back diff, lanes [2H:]
                x_ref[n:n + 1, k * F2:(k + 1) * F2] = jnp.where(fwd_mask, d_f, d_b)

    gather(lr_s_ref, ns, s_spans, xs_ref)
    gather(lr_l_ref, nl, l_spans, xl_ref)

    # TODO(synk): nn.Dropout on hidden_input (train mode) is stochastic; omitted (test path).
    hs = jnp.maximum(
        jnp.dot(xs_ref[...], ws1_ref[...], preferred_element_type=jnp.float32) + bs1_ref[...], 0.0)
    out_s_ref[...] = jnp.dot(hs, ws2_ref[...], preferred_element_type=jnp.float32) + bs2_ref[...]
    hl = jnp.maximum(
        jnp.dot(xl_ref[...], wl1_ref[...], preferred_element_type=jnp.float32) + bl1_ref[...], 0.0)
    out_l_ref[...] = jnp.dot(hl, wl2_ref[...], preferred_element_type=jnp.float32) + bl2_ref[...]


# -------------------------------- wrappers -----------------------------------
def encoder_pallas(embs_cat, slab1, slab2):
    S = embs_cat.shape[0]
    H = LSTM_UNITS
    return pl.pallas_call(
        functools.partial(_encoder_kernel, H=H),
        out_shape=jax.ShapeDtypeStruct((S, 4 * H), jnp.float32),
        in_specs=[_vmem(), _vmem(), _vmem()],
        out_specs=_vmem(),
        scratch_shapes=[pltpu.VMEM((S, 4 * H), jnp.float32)],
    )(embs_cat, slab1, slab2)


@jax.jit
def encode(params, slab1, slab2, word_ids, tag_ids):
    """Network.encode (test=True). Returns (S, 4H) slab; cols [:2H]=fwd, [2H:]=back."""
    embs = jnp.concatenate([params["word_emb"][word_ids],
                            params["tag_emb"][tag_ids]], axis=-1)           # (S, D)
    embs_cat = jnp.concatenate([embs, embs[::-1]], axis=-1)                 # (S, 2D)
    return encoder_pallas(embs_cat, slab1, slab2)


def evaluate_actions_both(struct_packed, label_packed, enc,
                          s_lefts, s_rights, l_lefts, l_rights,
                          s_spans=STRUCT_SPANS, l_spans=LABEL_SPANS):
    """Batched evaluate_action for struct AND label heads in a single pallas_call."""
    S = enc.shape[0]

    def prep(lefts, rights, spans):
        l = np.asarray(lefts, np.int32).reshape(-1, spans)
        r = np.asarray(rights, np.int32).reshape(-1, spans)
        assert (l >= 0).all() and (r < S).all(), "span indices out of range"
        assert (r + 1 <= S - 1).all(), "parser span invariant right+1 <= S-1 violated"
        lr = np.concatenate([l.reshape(-1), r.reshape(-1)]).astype(np.int32)
        return jnp.asarray(lr), l.shape[0]

    lr_s, ns = prep(s_lefts, s_rights, s_spans)
    lr_l, nl = prep(l_lefts, l_rights, l_spans)
    ws1, bs1, ws2, bs2 = struct_packed
    wl1, bl1, wl2, bl2 = label_packed
    out_s, out_l = pl.pallas_call(
        functools.partial(_score2_kernel, ns=ns, s_spans=s_spans, nl=nl, l_spans=l_spans),
        out_shape=(jax.ShapeDtypeStruct((ns, ws2.shape[1]), jnp.float32),
                   jax.ShapeDtypeStruct((nl, wl2.shape[1]), jnp.float32)),
        in_specs=[_smem(), _smem(), _vmem()] + [_vmem()] * 8,
        out_specs=(_vmem(), _vmem()),
        scratch_shapes=[pltpu.VMEM((ns, s_spans * 4 * LSTM_UNITS), jnp.float32),
                        pltpu.VMEM((nl, l_spans * 4 * LSTM_UNITS), jnp.float32)],
    )(lr_s, lr_l, enc, ws1, bs1, ws2, bs2, wl1, bl1, wl2, bl2)
    return out_s, out_l


def evaluate_action_pair(struct_packed, label_packed, enc,
                         s_lefts, s_rights, l_lefts, l_rights):
    """Single parser step: both heads scored in one launch; matches self.*_nn(...)[0]."""
    out_s, out_l = evaluate_actions_both(
        struct_packed, label_packed, enc,
        [list(s_lefts)], [list(s_rights)], [list(l_lefts)], [list(l_rights)])
    return out_s[0], out_l[0]


# ---------------------------- parameter init / packing -------------------------
def init_params(key):
    def u(k, shape):
        return jax.random.uniform(k, shape, jnp.float32, -0.01, 0.01)   # uniform_(-0.01, 0.01)

    def lstm_dir(k, in_dim, H):
        k1, k2, k3, k4 = jax.random.split(k, 4)
        return dict(w_ih=u(k1, (4 * H, in_dim)), w_hh=u(k2, (4 * H, H)),
                    b_ih=u(k3, (4 * H,)), b_hh=u(k4, (4 * H,)))

    ks = jax.random.split(key, 8)
    H, D = LSTM_UNITS, WORD_DIMS + TAG_DIMS
    return {
        "word_emb": u(ks[0], (TOTAL_WORDS, WORD_DIMS)),
        "tag_emb": u(ks[1], (TOTAL_TAGS, TAG_DIMS)),
        "lstm1_fw": lstm_dir(ks[2], D, H),
        "lstm1_bw": lstm_dir(ks[3], D, H),
        "lstm2_fw": lstm_dir(ks[4], 2 * H, H),
        "lstm2_bw": lstm_dir(ks[5], 2 * H, H),
        # struct_nn / label_nn: final Linear zero-initialized per Network.init_params
        "struct_nn": (u(jax.random.fold_in(ks[6], 0), (HIDDEN_UNITS, 4 * SINGLE_SPAN)),
                      u(jax.random.fold_in(ks[6], 1), (HIDDEN_UNITS,)),
                      jnp.zeros((2, HIDDEN_UNITS), jnp.float32),
                      jnp.zeros((2,), jnp.float32)),
        "label_nn": (u(jax.random.fold_in(ks[7], 0), (HIDDEN_UNITS, 3 * SINGLE_SPAN)),
                     u(jax.random.fold_in(ks[7], 1), (HIDDEN_UNITS,)),
                     jnp.zeros((TOTAL_LABEL_ACTIONS, HIDDEN_UNITS), jnp.float32),
                     jnp.zeros((TOTAL_LABEL_ACTIONS,), jnp.float32)),
    }


# packed gate order: (i, f, o, g); torch w_ih/w_hh row-block order is (i, f, g, o)
_GATE_ORDER = (0, 1, 3, 2)


def pack_encoder_params(params):
    """Pack per-direction PyTorch LSTM weights into one fused slab per layer.

    slab rows: [ W_sel (2*in, 8H) ; whh (2H, 8H) ; bias (1, 8H) ].
    Column layout (width H each): [i_f i_b f_f f_b o_f o_b g_f g_b].
    """
    H = LSTM_UNITS

    def gate_blocks(w):                    # w: (4H, in) torch layout -> 4 (in, H) blocks i,f,g,o
        wt = w.T
        return [wt[:, g * H:(g + 1) * H] for g in range(4)]

    def pack_layer(fw, bw, in_dim):
        bf, bb = gate_blocks(fw["w_ih"]), gate_blocks(bw["w_ih"])
        zf = jnp.zeros((in_dim, H), jnp.float32)
        top = jnp.concatenate(sum([[bf[g], zf] for g in _GATE_ORDER], []), axis=1)   # fw cols
        bot = jnp.concatenate(sum([[zf, bb[g]] for g in _GATE_ORDER], []), axis=1)   # bw cols
        w_sel = jnp.concatenate([top, bot], axis=0)                                   # (2*in, 8H)

        hf, hb = gate_blocks(fw["w_hh"]), gate_blocks(bw["w_hh"])
        zh = jnp.zeros((H, H), jnp.float32)
        htop = jnp.concatenate(sum([[hf[g], zh] for g in _GATE_ORDER], []), axis=1)
        hbot = jnp.concatenate(sum([[zh, hb[g]] for g in _GATE_ORDER], []), axis=1)
        whh = jnp.concatenate([htop, hbot], axis=0)                                    # (2H, 8H)

        gi = jnp.asarray(_GATE_ORDER)
        bfv = (fw["b_ih"] + fw["b_hh"]).reshape(4, H)[gi]
        bbv = (bw["b_ih"] + bw["b_hh"]).reshape(4, H)[gi]
        b = jnp.stack([bfv, bbv], axis=1).reshape(1, 8 * H)
        return jnp.concatenate([w_sel, whh, b], axis=0)          # (2*in + 2H + 1, 8H)

    D = WORD_DIMS + TAG_DIMS
    slab1 = pack_layer(params["lstm1_fw"], params["lstm1_bw"], D)         # (129, 256)
    slab2 = pack_layer(params["lstm2_fw"], params["lstm2_bw"], 2 * H)     # (193, 256)
    return slab1, slab2


def pack_head_params(w1, b1, w2, b2, num_spans, H=LSTM_UNITS):
    """Transpose MLP head weights and permute w1 rows to the per-span [fwd_k | back_k] layout."""
    span = 2 * H
    perm = []
    for k in range(num_spans):
        perm += list(range(k * span, (k + 1) * span))                                      # fwd_k
        perm += list(range(num_spans * span + k * span, num_spans * span + (k + 1) * span))  # back_k
    perm = jnp.asarray(perm, jnp.int32)
    return (w1.T[perm, :], b1[None, :], w2.T, b2[None, :])


# ----------------------------- pure-JAX reference ------------------------------
def _ref_lstm_direction(x, p, H):
    w_ih_t, w_hh_t, b = p["w_ih"].T, p["w_hh"].T, p["b_ih"] + p["b_hh"]

    def step(carry, x_t):
        h, c = carry
        gates = x_t @ w_ih_t + h @ w_hh_t + b
        i = jax.nn.sigmoid(gates[0:H])
        f = jax.nn.sigmoid(gates[H:2 * H])
        g = jnp.tanh(gates[2 * H:3 * H])
        o = jax.nn.sigmoid(gates[3 * H:4 * H])
        c = f * c + i * g
        h = o * jnp.tanh(c)
        return (h, c), h

    _, hs = lax.scan(step, (jnp.zeros(H), jnp.zeros(H)), x)
    return hs


def _ref_encode(params, word_ids, tag_ids):
    H = LSTM_UNITS
    embs = jnp.concatenate([params["word_emb"][word_ids],
                            params["tag_emb"][tag_ids]], axis=-1)
    fw1 = _ref_lstm_direction(embs, params["lstm1_fw"], H)
    bw1 = _ref_lstm_direction(embs[::-1], params["lstm1_bw"], H)[::-1]
    state1 = jnp.concatenate([fw1, bw1], axis=1)
    fw2 = _ref_lstm_direction(state1, params["lstm2_fw"], H)
    bw2 = _ref_lstm_direction(state1[::-1], params["lstm2_bw"], H)[::-1]
    return (jnp.concatenate([fw1, fw2], axis=1),
            jnp.concatenate([bw1, bw2], axis=1))


def _ref_evaluate(head, fwd, back, lefts, rights):
    w1, b1, w2, b2 = head   # PyTorch layouts
    feats = []
    for l, r in zip(lefts, rights):
        feats.append(fwd[r] - fwd[l - 1])       # negative indexing (left==0 -> last row) like torch
    for l, r in zip(lefts, rights):
        feats.append(back[l] - back[r + 1])
    x = jnp.concatenate(feats, axis=-1)
    h = jnp.maximum(x @ w1.T + b1, 0.0)
    return h @ w2.T + b2


# ------------------------------------ main -------------------------------------
if __name__ == "__main__":
    key = jax.random.PRNGKey(0)
    pkey, wkey, tkey, hkey = jax.random.split(key, 4)
    params = init_params(pkey)
    slab1, slab2 = pack_encoder_params(params)
    struct_packed = pack_head_params(*params["struct_nn"], num_spans=STRUCT_SPANS)
    label_packed = pack_head_params(*params["label_nn"], num_spans=LABEL_SPANS)

    word_ids = jax.random.randint(wkey, (SEQ_LEN,), 0, TOTAL_WORDS)
    tag_ids = jax.random.randint(tkey, (SEQ_LEN,), 0, TOTAL_TAGS)

    # fused encoder (test=True path); enc = [fwd | back], each (S, 2*lstm_units)
    enc = jax.block_until_ready(encode(params, slab1, slab2, word_ids, tag_ids))
    fwd, back = enc[:, :2 * LSTM_UNITS], enc[:, 2 * LSTM_UNITS:]

    fwd_ref, back_ref = _ref_encode(params, word_ids, tag_ids)
    assert jnp.allclose(fwd, fwd_ref, atol=1e-5), "fwd mismatch"
    assert jnp.allclose(back, back_ref, atol=1e-5), "back mismatch"

    # one parser step: struct + label heads scored in a single pallas_call
    # (spec-initialized heads: final layers zero-init per Network.init_params)
    struct_lefts, struct_rights = [1, 2, 3, 4], [2, 3, 4, 6]
    label_lefts, label_rights = [1, 2, 3], [3, 4, 6]
    struct_scores, label_scores = evaluate_action_pair(
        struct_packed, label_packed, enc,
        struct_lefts, struct_rights, label_lefts, label_rights)
    struct_scores, label_scores = jax.block_until_ready((struct_scores, label_scores))
    assert struct_scores.shape == (2,)
    assert label_scores.shape == (TOTAL_LABEL_ACTIONS,)

    # numeric check of the score path with random (non-zero) test heads, batched (N=2 per head):
    # the module's zero-initialized final layers would make a correctness check vacuous.
    def rnd_head(k, in_dim, out_dim):
        k1, k2, k3, k4 = jax.random.split(k, 4)
        u = lambda kk, s: jax.random.uniform(kk, s, jnp.float32, -0.1, 0.1)
        return (u(k1, (HIDDEN_UNITS, in_dim)), u(k2, (HIDDEN_UNITS,)),
                u(k3, (out_dim, HIDDEN_UNITS)), u(k4, (out_dim,)))

    th_struct = rnd_head(jax.random.fold_in(hkey, 0), 4 * SINGLE_SPAN, 2)
    th_label = rnd_head(jax.random.fold_in(hkey, 1), 3 * SINGLE_SPAN, TOTAL_LABEL_ACTIONS)

    s_lefts, s_rights = [[1, 2, 3, 4], [0, 1, 2, 5]], [[2, 3, 4, 6], [1, 3, 5, 6]]
    l_lefts, l_rights = [[1, 2, 3], [0, 2, 4]], [[3, 4, 6], [2, 5, 6]]
    s_scores, l_scores = evaluate_actions_both(
        pack_head_params(*th_struct, num_spans=STRUCT_SPANS),
        pack_head_params(*th_label, num_spans=LABEL_SPANS),
        enc, s_lefts, s_rights, l_lefts, l_rights)
    s_scores, l_scores = jax.block_until_ready((s_scores, l_scores))

    for n in range(2):
        ref = _ref_evaluate(th_struct, fwd_ref, back_ref, s_lefts[n], s_rights[n])
        assert jnp.allclose(s_scores[n], ref, atol=1e-4), "struct score mismatch"
        ref = _ref_evaluate(th_label, fwd_ref, back_ref, l_lefts[n], l_rights[n])
        assert jnp.allclose(l_scores[n], ref, atol=1e-4), "label score mismatch"

    print("KERNEL_OK")
</pallas_src>

<mosaic_0001>
module attributes {stable_mosaic.version = 11 : i64} {
  func.func @_encoder_kernel(%arg0: memref<8x64xf32, #tpu.memory_space<vmem>>, %arg1: memref<129x256xf32, #tpu.memory_space<vmem>>, %arg2: memref<193x256xf32, #tpu.memory_space<vmem>>, %arg3: memref<8x128xf32, #tpu.memory_space<vmem>>, %arg4: memref<8x128xf32, #tpu.memory_space<vmem>>) attributes {dimension_semantics = [], scalar_prefetch = 0 : i64, scratch_operands = 1 : i64, tpu.core_type = #tpu.core_type<tc>} {
    %c0 = arith.constant 0 : index
    %c0_0 = arith.constant 0 : index
    %0 = vector.load %arg1[%c0, %c0_0] : memref<129x256xf32, #tpu.memory_space<vmem>>, vector<64x256xf32>
    %c64 = arith.constant 64 : index
    %c0_1 = arith.constant 0 : index
    %1 = vector.load %arg1[%c64, %c0_1] : memref<129x256xf32, #tpu.memory_space<vmem>>, vector<64x256xf32>
    %c128 = arith.constant 128 : index
    %c0_2 = arith.constant 0 : index
    %2 = vector.load %arg1[%c128, %c0_2] : memref<129x256xf32, #tpu.memory_space<vmem>>, vector<1x256xf32>
    %c0_3 = arith.constant 0 : index
    %c0_4 = arith.constant 0 : index
    %3 = vector.load %arg0[%c0_3, %c0_4] : memref<8x64xf32, #tpu.memory_space<vmem>>, vector<8x64xf32>
    %cst = arith.constant dense<0.000000e+00> : vector<8x256xf32>
    %4 = tpu.matmul %3, %0, %cst {dimension_numbers = #tpu.dot_dimension_numbers<[1], [0], [0], [1], [0, 0, 1, 1], [], []>} : vector<8x64xf32>, vector<64x256xf32>, vector<8x256xf32> -> vector<8x256xf32>
    %5 = vector.broadcast %2 : vector<1x256xf32> to vector<8x256xf32>
    %6 = arith.addf %4, %5 : vector<8x256xf32>
    %cst_5 = arith.constant 0.000000e+00 : f32
    %7 = vector.broadcast %cst_5 : f32 to vector<1x64xf32>
    %cst_6 = arith.constant 0.000000e+00 : f32
    %8 = vector.broadcast %cst_6 : f32 to vector<1x64xf32>
    %9 = vector.extract_strided_slice %6 {offsets = [0, 0], sizes = [1, 256], strides = [1, 1]} : vector<8x256xf32> to vector<1x256xf32>
    %cst_7 = arith.constant dense<0.000000e+00> : vector<1x256xf32>
    %10 = tpu.matmul %7, %1, %cst_7 {dimension_numbers = #tpu.dot_dimension_numbers<[1], [0], [0], [1], [0, 0, 1, 1], [], []>} : vector<1x64xf32>, vector<64x256xf32>, vector<1x256xf32> -> vector<1x256xf32>
    %11 = arith.addf %9, %10 : vector<1x256xf32>
    %12 = vector.extract_strided_slice %11 {offsets = [0, 0], sizes = [1, 192], strides = [1, 1]} : vector<1x256xf32> to vector<1x192xf32>
    %13 = arith.negf %12 : vector<1x192xf32>
    %14 = math.exp %13 : vector<1x192xf32>
    %cst_8 = arith.constant 1.000000e+00 : f32
    %15 = vector.broadcast %cst_8 : f32 to vector<1x192xf32>
    %16 = arith.addf %15, %14 : vector<1x192xf32>
    %17 = arith.divf %15, %16 : vector<1x192xf32>
    %18 = vector.extract_strided_slice %17 {offsets = [0, 0], sizes = [1, 64], strides = [1, 1]} : vector<1x192xf32> to vector<1x64xf32>
    %19 = vector.extract_strided_slice %17 {offsets = [0, 64], sizes = [1, 64], strides = [1, 1]} : vector<1x192xf32> to vector<1x64xf32>
    %20 = vector.extract_strided_slice %17 {offsets = [0, 128], sizes = [1, 64], strides = [1, 1]} : vector<1x192xf32> to vector<1x64xf32>
    %21 = vector.extract_strided_slice %11 {offsets = [0, 192], sizes = [1, 64], strides = [1, 1]} : vector<1x256xf32> to vector<1x64xf32>
    %22 = math.tanh %21 : vector<1x64xf32>
    %23 = arith.mulf %19, %8 : vector<1x64xf32>
    %24 = arith.mulf %18, %22 : vector<1x64xf32>
    %25 = arith.addf %23, %24 : vector<1x64xf32>
    %26 = math.tanh %25 : vector<1x64xf32>
    %27 = arith.mulf %20, %26 : vector<1x64xf32>
    %28 = vector.extract_strided_slice %27 {offsets = [0, 0], sizes = [1, 32], strides = [1, 1]} : vector<1x64xf32> to vector<1x32xf32>
    %29 = vector.extract_strided_slice %27 {offsets = [0, 32], sizes = [1, 32], strides = [1, 1]} : vector<1x64xf32> to vector<1x32xf32>
    %c0_9 = arith.constant 0 : index
    %c0_10 = arith.constant 0 : index
    %30 = vector.load %arg4[%c0_9, %c0_10] : memref<8x128xf32, #tpu.memory_space<vmem>>, vector<1x32xf32>
    tpu.vector_store %arg4[%c0_9, %c0_10], %28 {strides = array<i32>} : memref<8x128xf32, #tpu.memory_space<vmem>>, vector<1x32xf32>,
    %c7 = arith.constant 7 : index
    %c32 = arith.constant 32 : index
    %31 = vector.load %arg4[%c7, %c32] : memref<8x128xf32, #tpu.memory_space<vmem>>, vector<1x32xf32>
    tpu.vector_store %arg4[%c7, %c32], %29 {strides = array<i32>} : memref<8x128xf32, #tpu.memory_space<vmem>>, vector<1x32xf32>,
    %c7_11 = arith.constant 7 : index
    %c64_12 = arith.constant 64 : index
    %32 = vector.load %arg4[%c7_11, %c64_12] : memref<8x128xf32, #tpu.memory_space<vmem>>, vector<1x32xf32>
    tpu.vector_store %arg4[%c7_11, %c64_12], %28 {strides = array<i32>} : memref<8x128xf32, #tpu.memory_space<vmem>>, vector<1x32xf32>,
    %c0_13 = arith.constant 0 : index
    %c96 = arith.constant 96 : index
    %33 = vector.load %arg4[%c0_13, %c96] : memref<8x128xf32, #tpu.memory_space<vmem>>, vector<1x32xf32>
    tpu.vector_store %arg4[%c0_13, %c96], %29 {strides = array<i32>} : memref<8x128xf32, #tpu.memory_space<vmem>>, vector<1x32xf32>,
    %34 = vector.extract_strided_slice %6 {offsets = [1, 0], sizes = [1, 256], strides = [1, 1]} : vector<8x256xf32> to vector<1x256xf32>
    %cst_14 = arith.constant dense<0.000000e+00> : vector<1x256xf32>
    %35 = tpu.matmul %27, %1, %cst_14 {dimension_numbers = #tpu.dot_dimension_numbers<[1], [0], [0], [1], [0, 0, 1, 1], [], []>} : vector<1x64xf32>, vector<64x256xf32>, vector<1x256xf32> -> vector<1x256xf32>
    %36 = arith.addf %34, %35 : vector<1x256xf32>
    %37 = vector.extract_strided_slice %36 {offsets = [0, 0], sizes = [1, 192], strides = [1, 1]} : vector<1x256xf32> to vector<1x192xf32>
    %38 = arith.negf %37 : vector<1x192xf32>
    %39 = math.exp %38 : vector<1x192xf32>
    %cst_15 = arith.constant 1.000000e+00 : f32
    %40 = vector.broadcast %cst_15 : f32 to vector<1x192xf32>
    %41 = arith.addf %40, %39 : vector<1x192xf32>
    %42 = arith.divf %40, %41 : vector<1x192xf32>
    %43 = vector.extract_strided_slice %42 {offsets = [0, 0], sizes = [1, 64], strides = [1, 1]} : vector<1x192xf32> to vector<1x64xf32>
    %44 = vector.extract_strided_slice %42 {offsets = [0, 64], sizes = [1, 64], strides = [1, 1]} : vector<1x192xf32> to vector<1x64xf32>
    %45 = vector.extract_strided_slice %42 {offsets = [0, 128], sizes = [1, 64], strides = [1, 1]} : vector<1x192xf32> to vector<1x64xf32>
    %46 = vector.extract_strided_slice %36 {offsets = [0, 192], sizes = [1, 64], strides = [1, 1]} : vector<1x256xf32> to vector<1x64xf32>
    %47 = math.tanh %46 : vector<1x64xf32>
    %48 = arith.mulf %44, %25 : vector<1x64xf32>
    %49 = arith.mulf %43, %47 : vector<1x64xf32>
    %50 = arith.addf %48, %49 : vector<1x64xf32>
    %51 = math.tanh %50 : vector<1x64xf32>
    %52 = arith.mulf %45, %51 : vector<1x64xf32>
    %53 = vector.extract_strided_slice %52 {offsets = [0, 0], sizes = [1, 32], strides = [1, 1]} : vector<1x64xf32> to vector<1x32xf32>
    %54 = vector.extract_strided_slice %52 {offsets = [0, 32], sizes = [1, 32], strides = [1, 1]} : vector<1x64xf32> to vector<1x32xf32>
    %c1 = arith.constant 1 : index
    %c0_16 = arith.constant 0 : index
    %55 = vector.load %arg4[%c1, %c0_16] : memref<8x128xf32, #tpu.memory_space<vmem>>, vector<1x32xf32>
    tpu.vector_store %arg4[%c1, %c0_16], %53 {strides = array<i32>} : memref<8x128xf32, #tpu.memory_space<vmem>>, vector<1x32xf32>,
    %c6 = arith.constant 6 : index
    %c32_17 = arith.constant 32 : index
    %56 = vector.load %arg4[%c6, %c32_17] : memref<8x128xf32, #tpu.memory_space<vmem>>, vector<1x32xf32>
    tpu.vector_store %arg4[%c6, %c32_17], %54 {strides = array<i32>} : memref<8x128xf32, #tpu.memory_space<vmem>>, vector<1x32xf32>,
    %c6_18 = arith.constant 6 : index
    %c64_19 = arith.constant 64 : index
    %57 = vector.load %arg4[%c6_18, %c64_19] : memref<8x128xf32, #tpu.memory_space<vmem>>, vector<1x32xf32>
    tpu.vector_store %arg4[%c6_18, %c64_19], %53 {strides = array<i32>} : memref<8x128xf32, #tpu.memory_space<vmem>>, vector<1x32xf32>,
    %c1_20 = arith.constant 1 : index
    %c96_21 = arith.constant 96 : index
    %58 = vector.load %arg4[%c1_20, %c96_21] : memref<8x128xf32, #tpu.memory_space<vmem>>, vector<1x32xf32>
    tpu.vector_store %arg4[%c1_20, %c96_21], %54 {strides = array<i32>} : memref<8x128xf32, #tpu.memory_space<vmem>>, vector<1x32xf32>,
    %59 = vector.extract_strided_slice %6 {offsets = [2, 0], sizes = [1, 256], strides = [1, 1]} : vector<8x256xf32> to vector<1x256xf32>
    %cst_22 = arith.constant dense<0.000000e+00> : vector<1x256xf32>
    %60 = tpu.matmul %52, %1, %cst_22 {dimension_numbers = #tpu.dot_dimension_numbers<[1], [0], [0], [1], [0, 0, 1, 1], [], []>} : vector<1x64xf32>, vector<64x256xf32>, vector<1x256xf32> -> vector<1x256xf32>
    %61 = arith.addf %59, %60 : vector<1x256xf32>
    %62 = vector.extract_strided_slice %61 {offsets = [0, 0], sizes = [1, 192], strides = [1, 1]} : vector<1x256xf32> to vector<1x192xf32>
    %63 = arith.negf %62 : vector<1x192xf32>
    %64 = math.exp %63 : vector<1x192xf32>
    %cst_23 = arith.constant 1.000000e+00 : f32
    %65 = vector.broadcast %cst_23 : f32 to vector<1x192xf32>
    %66 = arith.addf %65, %64 : vector<1x192xf32>
    %67 = arith.divf %65, %66 : vector<1x192xf32>
    %68 = vector.extract_strided_slice %67 {offsets = [0, 0], sizes = [1, 64], strides = [1, 1]} : vector<1x192xf32> to vector<1x64xf32>
    %69 = vector.extract_strided_slice %67 {offsets = [0, 64], sizes = [1, 64], strides = [1, 1]} : vector<1x192xf32> to vector<1x64xf32>
    %70 = vector.extract_strided_slice %67 {offsets = [0, 128], sizes = [1, 64], strides = [1, 1]} : vector<1x192xf32> to vector<1x64xf32>
    %71 = vector.extract_strided_slice %61 {offsets = [0, 192], sizes = [1, 64], strides = [1, 1]} : vector<1x256xf32> to vector<1x64xf32>
    %72 = math.tanh %71 : vector<1x64xf32>
    %73 = arith.mulf %69, %50 : vector<1x64xf32>
    %74 = arith.mulf %68, %72 : vector<1x64xf32>
    %75 = arith.addf %73, %74 : vector<1x64xf32>
    %76 = math.tanh %75 : vector<1x64xf32>
    %77 = arith.mulf %70, %76 : vector<1x64xf32>
    %78 = vector.extract_strided_slice %77 {offsets = [0, 0], sizes = [1, 32], strides = [1, 1]} : vector<1x64xf32> to vector<1x32xf32>
    %79 = vector.extract_strided_slice %77 {offsets = [0, 32], sizes = [1, 32], strides = [1, 1]} : vector<1x64xf32> to vector<1x32xf32>
    %c2 = arith.constant 2 : index
    %c0_24 = arith.constant 0 : index
    %80 = vector.load %arg4[%c2, %c0_24] : memref<8x128xf32, #tpu.memory_space<vmem>>, vector<1x32xf32>
    tpu.vector_store %arg4[%c2, %c0_24], %78 {strides = array<i32>} : memref<8x128xf32, #tpu.memory_space<vmem>>, vector<1x32xf32>,
    %c5 = arith.constant 5 : index
    %c32_25 = arith.constant 32 : index
    %81 = vector.load %arg4[%c5, %c32_25] : memref<8x128xf32, #tpu.memory_space<vmem>>, vector<1x32xf32>
    tpu.vector_store %arg4[%c5, %c32_25], %79 {strides = array<i32>} : memref<8x128xf32, #tpu.memory_space<vmem>>, vector<1x32xf32>,
    %c5_26 = arith.constant 5 : index
    %c64_27 = arith.constant 64 : index
    %82 = vector.load %arg4[%c5_26, %c64_27] : memref<8x128xf32, #tpu.memory_space<vmem>>, vector<1x32xf32>
    tpu.vector_store %arg4[%c5_26, %c64_27], %78 {strides = array<i32>} : memref<8x128xf32, #tpu.memory_space<vmem>>, vector<1x32xf32>,
    %c2_28 = arith.constant 2 : index
    %c96_29 = arith.constant 96 : index
    %83 = vector.load %arg4[%c2_28, %c96_29] : memref<8x128xf32, #tpu.memory_space<vmem>>, vector<1x32xf32>
    tpu.vector_store %arg4[%c2_28, %c96_29], %79 {strides = array<i32>} : memref<8x128xf32, #tpu.memory_space<vmem>>, vector<1x32xf32>,
    %84 = vector.extract_strided_slice %6 {offsets = [3, 0], sizes = [1, 256], strides = [1, 1]} : vector<8x256xf32> to vector<1x256xf32>
    %cst_30 = arith.constant dense<0.000000e+00> : vector<1x256xf32>
    %85 = tpu.matmul %77, %1, %cst_30 {dimension_numbers = #tpu.dot_dimension_numbers<[1], [0], [0], [1], [0, 0, 1, 1], [], []>} : vector<1x64xf32>, vector<64x256xf32>, vector<1x256xf32> -> vector<1x256xf32>
    %86 = arith.addf %84, %85 : vector<1x256xf32>
    %87 = vector.extract_strided_slice %86 {offsets = [0, 0], sizes = [1, 192], strides = [1, 1]} : vector<1x256xf32> to vector<1x192xf32>
    %88 = arith.negf %87 : vector<1x192xf32>
    %89 = math.exp %88 : vector<1x192xf32>
    %cst_31 = arith.constant 1.000000e+00 : f32
    %90 = vector.broadcast %cst_31 : f32 to vector<1x192xf32>
    %91 = arith.addf %90, %89 : vector<1x192xf32>
    %92 = arith.divf %90, %91 : vector<1x192xf32>
    %93 = vector.extract_strided_slice %92 {offsets = [0, 0], sizes = [1, 64], strides = [1, 1]} : vector<1x192xf32> to vector<1x64xf32>
    %94 = vector.extract_strided_slice %92 {offsets = [0, 64], sizes = [1, 64], strides = [1, 1]} : vector<1x192xf32> to vector<1x64xf32>
    %95 = vector.extract_strided_slice %92 {offsets = [0, 128], sizes = [1, 64], strides = [1, 1]} : vector<1x192xf32> to vector<1x64xf32>
    %96 = vector.extract_strided_slice %86 {offsets = [0, 192], sizes = [1, 64], strides = [1, 1]} : vector<1x256xf32> to vector<1x64xf32>
    %97 = math.tanh %96 : vector<1x64xf32>
    %98 = arith.mulf %94, %75 : vector<1x64xf32>
    %99 = arith.mulf %93, %97 : vector<1x64xf32>
    %100 = arith.addf %98, %99 : vector<1x64xf32>
    %101 = math.tanh %100 : vector<1x64xf32>
    %102 = arith.mulf %95, %101 : vector<1x64xf32>
    %103 = vector.extract_strided_slice %102 {offsets = [0, 0], sizes = [1, 32], strides = [1, 1]} : vector<1x64xf32> to vector<1x32xf32>
    %104 = vector.extract_strided_slice %102 {offsets = [0, 32], sizes = [1, 32], strides = [1, 1]} : vector<1x64xf32> to vector<1x32xf32>
    %c3 = arith.constant 3 : index
    %c0_32 = arith.constant 0 : index
    %105 = vector.load %arg4[%c3, %c0_32] : memref<8x128xf32, #tpu.memory_space<vmem>>, vector<1x32xf32>
    tpu.vector_store %arg4[%c3, %c0_32], %103 {strides = array<i32>} : memref<8x128xf32, #tpu.memory_space<vmem>>, vector<1x32xf32>,
    %c4 = arith.constant 4 : index
    %c32_33 = arith.constant 32 : index
    %106 = vector.load %arg4[%c4, %c32_33] : memref<8x128xf32, #tpu.memory_space<vmem>>, vector<1x32xf32>
    tpu.vector_store %arg4[%c4, %c32_33], %104 {strides = array<i32>} : memref<8x128xf32, #tpu.memory_space<vmem>>, vector<1x32xf32>,
    %c4_34 = arith.constant 4 : index
    %c64_35 = arith.constant 64 : index
    %107 = vector.load %arg4[%c4_34, %c64_35] : memref<8x128xf32, #tpu.memory_space<vmem>>, vector<1x32xf32>
    tpu.vector_store %arg4[%c4_34, %c64_35], %103 {strides = array<i32>} : memref<8x128xf32, #tpu.memory_space<vmem>>, vector<1x32xf32>,
    %c3_36 = arith.constant 3 : index
    %c96_37 = arith.constant 96 : index
    %108 = vector.load %arg4[%c3_36, %c96_37] : memref<8x128xf32, #tpu.memory_space<vmem>>, vector<1x32xf32>
    tpu.vector_store %arg4[%c3_36, %c96_37], %104 {strides = array<i32>} : memref<8x128xf32, #tpu.memory_space<vmem>>, vector<1x32xf32>,
    %109 = vector.extract_strided_slice %6 {offsets = [4, 0], sizes = [1, 256], strides = [1, 1]} : vector<8x256xf32> to vector<1x256xf32>
    %cst_38 = arith.constant dense<0.000000e+00> : vector<1x256xf32>
    %110 = tpu.matmul %102, %1, %cst_38 {dimension_numbers = #tpu.dot_dimension_numbers<[1], [0], [0], [1], [0, 0, 1, 1], [], []>} : vector<1x64xf32>, vector<64x256xf32>, vector<1x256xf32> -> vector<1x256xf32>
    %111 = arith.addf %109, %110 : vector<1x256xf32>
    %112 = vector.extract_strided_slice %111 {offsets = [0, 0], sizes = [1, 192], strides = [1, 1]} : vector<1x256xf32> to vector<1x192xf32>
    %113 = arith.negf %112 : vector<1x192xf32>
    %114 = math.exp %113 : vector<1x192xf32>
    %cst_39 = arith.constant 1.000000e+00 : f32
    %115 = vector.broadcast %cst_39 : f32 to vector<1x192xf32>
    %116 = arith.addf %115, %114 : vector<1x192xf32>
    %117 = arith.divf %115, %116 : vector<1x192xf32>
    %118 = vector.extract_strided_slice %117 {offsets = [0, 0], sizes = [1, 64], strides = [1, 1]} : vector<1x192xf32> to vector<1x64xf32>
    %119 = vector.extract_strided_slice %117 {offsets = [0, 64], sizes = [1, 64], strides = [1, 1]} : vector<1x192xf32> to vector<1x64xf32>
    %120 = vector.extract_strided_slice %117 {offsets = [0, 128], sizes = [1, 64], strides = [1, 1]} : vector<1x192xf32> to vector<1x64xf32>
    %121 = vector.extract_strided_slice %111 {offsets = [0, 192], sizes = [1, 64], strides = [1, 1]} : vector<1x256xf32> to vector<1x64xf32>
    %122 = math.tanh %121 : vector<1x64xf32>
    %123 = arith.mulf %119, %100 : vector<1x64xf32>
    %124 = arith.mulf %118, %122 : vector<1x64xf32>
    %125 = arith.addf %123, %124 : vector<1x64xf32>
    %126 = math.tanh %125 : vector<1x64xf32>
    %127 = arith.mulf %120, %126 : vector<1x64xf32>
    %128 = vector.extract_strided_slice %127 {offsets = [0, 0], sizes = [1, 32], strides = [1, 1]} : vector<1x64xf32> to vector<1x32xf32>
    %129 = vector.extract_strided_slice %127 {offsets = [0, 32], sizes = [1, 32], strides = [1, 1]} : vector<1x64xf32> to vector<1x32xf32>
    %c4_40 = arith.constant 4 : index
    %c0_41 = arith.constant 0 : index
    %130 = vector.load %arg4[%c4_40, %c0_41] : memref<8x128xf32, #tpu.memory_space<vmem>>, vector<1x32xf32>
    tpu.vector_store %arg4[%c4_40, %c0_41], %128 {strides = array<i32>} : memref<8x128xf32, #tpu.memory_space<vmem>>, vector<1x32xf32>,
    %c3_42 = arith.constant 3 : index
    %c32_43 = arith.constant 32 : index
    %131 = vector.load %arg4[%c3_42, %c32_43] : memref<8x128xf32, #tpu.memory_space<vmem>>, vector<1x32xf32>
    tpu.vector_store %arg4[%c3_42, %c32_43], %129 {strides = array<i32>} : memref<8x128xf32, #tpu.memory_space<vmem>>, vector<1x32xf32>,
    %c3_44 = arith.constant 3 : index
    %c64_45 = arith.constant 64 : index
    %132 = vector.load %arg4[%c3_44, %c64_45] : memref<8x128xf32, #tpu.memory_space<vmem>>, vector<1x32xf32>
    tpu.vector_store %arg4[%c3_44, %c64_45], %128 {strides = array<i32>} : memref<8x128xf32, #tpu.memory_space<vmem>>, vector<1x32xf32>,
    %c4_46 = arith.constant 4 : index
    %c96_47 = arith.constant 96 : index
    %133 = vector.load %arg4[%c4_46, %c96_47] : memref<8x128xf32, #tpu.memory_space<vmem>>, vector<1x32xf32>
    tpu.vector_store %arg4[%c4_46, %c96_47], %129 {strides = array<i32>} : memref<8x128xf32, #tpu.memory_space<vmem>>, vector<1x32xf32>,
    %134 = vector.extract_strided_slice %6 {offsets = [5, 0], sizes = [1, 256], strides = [1, 1]} : vector<8x256xf32> to vector<1x256xf32>
    %cst_48 = arith.constant dense<0.000000e+00> : vector<1x256xf32>
    %135 = tpu.matmul %127, %1, %cst_48 {dimension_numbers = #tpu.dot_dimension_numbers<[1], [0], [0], [1], [0, 0, 1, 1], [], []>} : vector<1x64xf32>, vector<64x256xf32>, vector<1x256xf32> -> vector<1x256xf32>
    %136 = arith.addf %134, %135 : vector<1x256xf32>
    %137 = vector.extract_strided_slice %136 {offsets = [0, 0], sizes = [1, 192], strides = [1, 1]} : vector<1x256xf32> to vector<1x192xf32>
    %138 = arith.negf %137 : vector<1x192xf32>
    %139 = math.exp %138 : vector<1x192xf32>
    %cst_49 = arith.constant 1.000000e+00 : f32
    %140 = vector.broadcast %cst_49 : f32 to vector<1x192xf32>
    %141 = arith.addf %140, %139 : vector<1x192xf32>
    %142 = arith.divf %140, %141 : vector<1x192xf32>
    %143 = vector.extract_strided_slice %142 {offsets = [0, 0], sizes = [1, 64], strides = [1, 1]} : vector<1x192xf32> to vector<1x64xf32>
    %144 = vector.extract_strided_slice %142 {offsets = [0, 64], sizes = [1, 64], strides = [1, 1]} : vector<1x192xf32> to vector<1x64xf32>
    %145 = vector.extract_strided_slice %142 {offsets = [0, 128], sizes = [1, 64], strides = [1, 1]} : vector<1x192xf32> to vector<1x64xf32>
    %146 = vector.extract_strided_slice %136 {offsets = [0, 192], sizes = [1, 64], strides = [1, 1]} : vector<1x256xf32> to vector<1x64xf32>
    %147 = math.tanh %146 : vector<1x64xf32>
    %148 = arith.mulf %144, %125 : vector<1x64xf32>
    %149 = arith.mulf %143, %147 : vector<1x64xf32>
    %150 = arith.addf %148, %149 : vector<1x64xf32>
    %151 = math.tanh %150 : vector<1x64xf32>
    %152 = arith.mulf %145, %151 : vector<1x64xf32>
    %153 = vector.extract_strided_slice %152 {offsets = [0, 0], sizes = [1, 32], strides = [1, 1]} : vector<1x64xf32> to vector<1x32xf32>
    %154 = vector.extract_strided_slice %152 {offsets = [0, 32], sizes = [1, 32], strides = [1, 1]} : vector<1x64xf32> to vector<1x32xf32>
    %c5_50 = arith.constant 5 : index
    %c0_51 = arith.constant 0 : index
    %155 = vector.load %arg4[%c5_50, %c0_51] : memref<8x128xf32, #tpu.memory_space<vmem>>, vector<1x32xf32>
    tpu.vector_store %arg4[%c5_50, %c0_51], %153 {strides = array<i32>} : memref<8x128xf32, #tpu.memory_space<vmem>>, vector<1x32xf32>,
    %c2_52 = arith.constant 2 : index
    %c32_53 = arith.constant 32 : index
    %156 = vector.load %arg4[%c2_52, %c32_53] : memref<8x128xf32, #tpu.memory_space<vmem>>, vector<1x32xf32>
    tpu.vector_store %arg4[%c2_52, %c32_53], %154 {strides = array<i32>} : memref<8x128xf32, #tpu.memory_space<vmem>>, vector<1x32xf32>,
    %c2_54 = arith.constant 2 : index
    %c64_55 = arith.constant 64 : index
    %157 = vector.load %arg4[%c2_54, %c64_55] : memref<8x128xf32, #tpu.memory_space<vmem>>, vector<1x32xf32>
    tpu.vector_store %arg4[%c2_54, %c64_55], %153 {strides = array<i32>} : memref<8x128xf32, #tpu.memory_space<vmem>>, vector<1x32xf32>,
    %c5_56 = arith.constant 5 : index
    %c96_57 = arith.constant 96 : index
    %158 = vector.load %arg4[%c5_56, %c96_57] : memref<8x128xf32, #tpu.memory_space<vmem>>, vector<1x32xf32>
    tpu.vector_store %arg4[%c5_56, %c96_57], %154 {strides = array<i32>} : memref<8x128xf32, #tpu.memory_space<vmem>>, vector<1x32xf32>,
    %159 = vector.extract_strided_slice %6 {offsets = [6, 0], sizes = [1, 256], strides = [1, 1]} : vector<8x256xf32> to vector<1x256xf32>
    %cst_58 = arith.constant dense<0.000000e+00> : vector<1x256xf32>
    %160 = tpu.matmul %152, %1, %cst_58 {dimension_numbers = #tpu.dot_dimension_numbers<[1], [0], [0], [1], [0, 0, 1, 1], [], []>} : vector<1x64xf32>, vector<64x256xf32>, vector<1x256xf32> -> vector<1x256xf32>
    %161 = arith.addf %159, %160 : vector<1x256xf32>
    %162 = vector.extract_strided_slice %161 {offsets = [0, 0], sizes = [1, 192], strides = [1, 1]} : vector<1x256xf32> to vector<1x192xf32>
    %163 = arith.negf %162 : vector<1x192xf32>
    %164 = math.exp %163 : vector<1x192xf32>
    %cst_59 = arith.constant 1.000000e+00 : f32
    %165 = vector.broadcast %cst_59 : f32 to vector<1x192xf32>
    %166 = arith.addf %165, %164 : vector<1x192xf32>
    %167 = arith.divf %165, %166 : vector<1x192xf32>
    %168 = vector.extract_strided_slice %167 {offsets = [0, 0], sizes = [1, 64], strides = [1, 1]} : vector<1x192xf32> to vector<1x64xf32>
    %169 = vector.extract_strided_slice %167 {offsets = [0, 64], sizes = [1, 64], strides = [1, 1]} : vector<1x192xf32> to vector<1x64xf32>
    %170 = vector.extract_strided_slice %167 {offsets = [0, 128], sizes = [1, 64], strides = [1, 1]} : vector<1x192xf32> to vector<1x64xf32>
    %171 = vector.extract_strided_slice %161 {offsets = [0, 192], sizes = [1, 64], strides = [1, 1]} : vector<1x256xf32> to vector<1x64xf32>
    %172 = math.tanh %171 : vector<1x64xf32>
    %173 = arith.mulf %169, %150 : vector<1x64xf32>
    %174 = arith.mulf %168, %172 : vector<1x64xf32>
    %175 = arith.addf %173, %174 : vector<1x64xf32>
    %176 = math.tanh %175 : vector<1x64xf32>
    %177 = arith.mulf %170, %176 : vector<1x64xf32>
    %178 = vector.extract_strided_slice %177 {offsets = [0, 0], sizes = [1, 32], strides = [1, 1]} : vector<1x64xf32> to vector<1x32xf32>
    %179 = vector.extract_strided_slice %177 {offsets = [0, 32], sizes = [1, 32], strides = [1, 1]} : vector<1x64xf32> to vector<1x32xf32>
    %c6_60 = arith.constant 6 : index
    %c0_61 = arith.constant 0 : index
    %180 = vector.load %arg4[%c6_60, %c0_61] : memref<8x128xf32, #tpu.memory_space<vmem>>, vector<1x32xf32>
    tpu.vector_store %arg4[%c6_60, %c0_61], %178 {strides = array<i32>} : memref<8x128xf32, #tpu.memory_space<vmem>>, vector<1x32xf32>,
    %c1_62 = arith.constant 1 : index
    %c32_63 = arith.constant 32 : index
    %181 = vector.load %arg4[%c1_62, %c32_63] : memref<8x128xf32, #tpu.memory_space<vmem>>, vector<1x32xf32>
    tpu.vector_store %arg4[%c1_62, %c32_63], %179 {strides = array<i32>} : memref<8x128xf32, #tpu.memory_space<vmem>>, vector<1x32xf32>,
    %c1_64 = arith.constant 1 : index
    %c64_65 = arith.constant 64 : index
    %182 = vector.load %arg4[%c1_64, %c64_65] : memref<8x128xf32, #tpu.memory_space<vmem>>, vector<1x32xf32>
    tpu.vector_store %arg4[%c1_64, %c64_65], %178 {strides = array<i32>} : memref<8x128xf32, #tpu.memory_space<vmem>>, vector<1x32xf32>,
    %c6_66 = arith.constant 6 : index
    %c96_67 = arith.constant 96 : index
    %183 = vector.load %arg4[%c6_66, %c96_67] : memref<8x128xf32, #tpu.memory_space<vmem>>, vector<1x32xf32>
    tpu.vector_store %arg4[%c6_66, %c96_67], %179 {strides = array<i32>} : memref<8x128xf32, #tpu.memory_space<vmem>>, vector<1x32xf32>,
    %184 = vector.extract_strided_slice %6 {offsets = [7, 0], sizes = [1, 256], strides = [1, 1]} : vector<8x256xf32> to vector<1x256xf32>
    %cst_68 = arith.constant dense<0.000000e+00> : vector<1x256xf32>
    %185 = tpu.matmul %177, %1, %cst_68 {dimension_numbers = #tpu.dot_dimension_numbers<[1], [0], [0], [1], [0, 0, 1, 1], [], []>} : vector<1x64xf32>, vector<64x256xf32>, vector<1x256xf32> -> vector<1x256xf32>
    %186 = arith.addf %184, %185 : vector<1x256xf32>
    %187 = vector.extract_strided_slice %186 {offsets = [0, 0], sizes = [1, 192], strides = [1, 1]} : vector<1x256xf32> to vector<1x192xf32>
    %188 = arith.negf %187 : vector<1x192xf32>
    %189 = math.exp %188 : vector<1x192xf32>
    %cst_69 = arith.constant 1.000000e+00 : f32
    %190 = vector.broadcast %cst_69 : f32 to vector<1x192xf32>
    %191 = arith.addf %190, %189 : vector<1x192xf32>
    %192 = arith.divf %190, %191 : vector<1x192xf32>
    %193 = vector.extract_strided_slice %192 {offsets = [0, 0], sizes = [1, 64], strides = [1, 1]} : vector<1x192xf32> to vector<1x64xf32>
    %194 = vector.extract_strided_slice %192 {offsets = [0, 64], sizes = [1, 64], strides = [1, 1]} : vector<1x192xf32> to vector<1x64xf32>
    %195 = vector.extract_strided_slice %192 {offsets = [0, 128], sizes = [1, 64], strides = [1, 1]} : vector<1x192xf32> to vector<1x64xf32>
    %196 = vector.extract_strided_slice %186 {offsets = [0, 192], sizes = [1, 64], strides = [1, 1]} : vector<1x256xf32> to vector<1x64xf32>
    %197 = math.tanh %196 : vector<1x64xf32>
    %198 = arith.mulf %194, %175 : vector<1x64xf32>
    %199 = arith.mulf %193, %197 : vector<1x64xf32>
    %200 = arith.addf %198, %199 : vector<1x64xf32>
    %201 = math.tanh %200 : vector<1x64xf32>
    %202 = arith.mulf %195, %201 : vector<1x64xf32>
    %203 = vector.extract_strided_slice %202 {offsets = [0, 0], sizes = [1, 32], strides = [1, 1]} : vector<1x64xf32> to vector<1x32xf32>
    %204 = vector.extract_strided_slice %202 {offsets = [0, 32], sizes = [1, 32], strides = [1, 1]} : vector<1x64xf32> to vector<1x32xf32>
    %c7_70 = arith.constant 7 : index
    %c0_71 = arith.constant 0 : index
    %205 = vector.load %arg4[%c7_70, %c0_71] : memref<8x128xf32, #tpu.memory_space<vmem>>, vector<1x32xf32>
    tpu.vector_store %arg4[%c7_70, %c0_71], %203 {strides = array<i32>} : memref<8x128xf32, #tpu.memory_space<vmem>>, vector<1x32xf32>,
    %c0_72 = arith.constant 0 : index
    %c32_73 = arith.constant 32 : index
    %206 = vector.load %arg4[%c0_72, %c32_73] : memref<8x128xf32, #tpu.memory_space<vmem>>, vector<1x32xf32>
    tpu.vector_store %arg4[%c0_72, %c32_73], %204 {strides = array<i32>} : memref<8x128xf32, #tpu.memory_space<vmem>>, vector<1x32xf32>,
    %c0_74 = arith.constant 0 : index
    %c64_75 = arith.constant 64 : index
    %207 = vector.load %arg4[%c0_74, %c64_75] : memref<8x128xf32, #tpu.memory_space<vmem>>, vector<1x32xf32>
    tpu.vector_store %arg4[%c0_74, %c64_75], %203 {strides = array<i32>} : memref<8x128xf32, #tpu.memory_space<vmem>>, vector<1x32xf32>,
    %c7_76 = arith.constant 7 : index
    %c96_77 = arith.constant 96 : index
    %208 = vector.load %arg4[%c7_76, %c96_77] : memref<8x128xf32, #tpu.memory_space<vmem>>, vector<1x32xf32>
    tpu.vector_store %arg4[%c7_76, %c96_77], %204 {strides = array<i32>} : memref<8x128xf32, #tpu.memory_space<vmem>>, vector<1x32xf32>,
    %c0_78 = arith.constant 0 : index
    %c0_79 = arith.constant 0 : index
    %209 = vector.load %arg2[%c0_78, %c0_79] : memref<193x256xf32, #tpu.memory_space<vmem>>, vector<128x256xf32>
    %c128_80 = arith.constant 128 : index
    %c0_81 = arith.constant 0 : index
    %210 = vector.load %arg2[%c128_80, %c0_81] : memref<193x256xf32, #tpu.memory_space<vmem>>, vector<64x256xf32>
    %c192 = arith.constant 192 : index
    %c0_82 = arith.constant 0 : index
    %211 = vector.load %arg2[%c192, %c0_82] : memref<193x256xf32, #tpu.memory_space<vmem>>, vector<1x256xf32>
    %c0_83 = arith.constant 0 : index
    %c0_84 = arith.constant 0 : index
    %212 = vector.load %arg4[%c0_83, %c0_84] : memref<8x128xf32, #tpu.memory_space<vmem>>, vector<8x128xf32>
    %cst_85 = arith.constant dense<0.000000e+00> : vector<8x256xf32>
    %213 = tpu.matmul %212, %209, %cst_85 {dimension_numbers = #tpu.dot_dimension_numbers<[1], [0], [0], [1], [0, 0, 1, 1], [], []>} : vector<8x128xf32>, vector<128x256xf32>, vector<8x256xf32> -> vector<8x256xf32>
    %214 = vector.broadcast %211 : vector<1x256xf32> to vector<8x256xf32>
    %215 = arith.addf %213, %214 : vector<8x256xf32>
    %cst_86 = arith.constant 0.000000e+00 : f32
    %216 = vector.broadcast %cst_86 : f32 to vector<1x64xf32>
    %cst_87 = arith.constant 0.000000e+00 : f32
    %217 = vector.broadcast %cst_87 : f32 to vector<1x64xf32>
    %218 = vector.extract_strided_slice %215 {offsets = [0, 0], sizes = [1, 256], strides = [1, 1]} : vector<8x256xf32> to vector<1x256xf32>
    %cst_88 = arith.constant dense<0.000000e+00> : vector<1x256xf32>
    %219 = tpu.matmul %216, %210, %cst_88 {dimension_numbers = #tpu.dot_dimension_numbers<[1], [0], [0], [1], [0, 0, 1, 1], [], []>} : vector<1x64xf32>, vector<64x256xf32>, vector<1x256xf32> -> vector<1x256xf32>
    %220 = arith.addf %218, %219 : vector<1x256xf32>
    %221 = vector.extract_strided_slice %220 {offsets = [0, 0], sizes = [1, 192], strides = [1, 1]} : vector<1x256xf32> to vector<1x192xf32>
    %222 = arith.negf %221 : vector<1x192xf32>
    %223 = math.exp %222 : vector<1x192xf32>
    %cst_89 = arith.constant 1.000000e+00 : f32
    %224 = vector.broadcast %cst_89 : f32 to vector<1x192xf32>
    %225 = arith.addf %224, %223 : vector<1x192xf32>
    %226 = arith.divf %224, %225 : vector<1x192xf32>
    %227 = vector.extract_strided_slice %226 {offsets = [0, 0], sizes = [1, 64], strides = [1, 1]} : vector<1x192xf32> to vector<1x64xf32>
    %228 = vector.extract_strided_slice %226 {offsets = [0, 64], sizes = [1, 64], strides = [1, 1]} : vector<1x192xf32> to vector<1x64xf32>
    %229 = vector.extract_strided_slice %226 {offsets = [0, 128], sizes = [1, 64], strides = [1, 1]} : vector<1x192xf32> to vector<1x64xf32>
    %230 = vector.extract_strided_slice %220 {offsets = [0, 192], sizes = [1, 64], strides = [1, 1]} : vector<1x256xf32> to vector<1x64xf32>
    %231 = math.tanh %230 : vector<1x64xf32>
    %232 = arith.mulf %228, %217 : vector<1x64xf32>
    %233 = arith.mulf %227, %231 : vector<1x64xf32>
    %234 = arith.addf %232, %233 : vector<1x64xf32>
    %235 = math.tanh %234 : vector<1x64xf32>
    %236 = arith.mulf %229, %235 : vector<1x64xf32>
    %237 = vector.extract_strided_slice %236 {offsets = [0, 0], sizes = [1, 32], strides = [1, 1]} : vector<1x64xf32> to vector<1x32xf32>
    %c0_90 = arith.constant 0 : index
    %c32_91 = arith.constant 32 : index
    %238 = vector.load %arg3[%c0_90, %c32_91] : memref<8x128xf32, #tpu.memory_space<vmem>>, vector<1x32xf32>
    tpu.vector_store %arg3[%c0_90, %c32_91], %237 {strides = array<i32>} : memref<8x128xf32, #tpu.memory_space<vmem>>, vector<1x32xf32>,
    %239 = vector.extract_strided_slice %236 {offsets = [0, 32], sizes = [1, 32], strides = [1, 1]} : vector<1x64xf32> to vector<1x32xf32>
    %c7_92 = arith.constant 7 : index
    %c96_93 = arith.constant 96 : index
    %240 = vector.load %arg3[%c7_92, %c96_93] : memref<8x128xf32, #tpu.memory_space<vmem>>, vector<1x32xf32>
    tpu.vector_store %arg3[%c7_92, %c96_93], %239 {strides = array<i32>} : memref<8x128xf32, #tpu.memory_space<vmem>>, vector<1x32xf32>,
    %241 = vector.extract_strided_slice %215 {offsets = [1, 0], sizes = [1, 256], strides = [1, 1]} : vector<8x256xf32> to vector<1x256xf32>
    %cst_94 = arith.constant dense<0.000000e+00> : vector<1x256xf32>
    %242 = tpu.matmul %236, %210, %cst_94 {dimension_numbers = #tpu.dot_dimension_numbers<[1], [0], [0], [1], [0, 0, 1, 1], [], []>} : vector<1x64xf32>, vector<64x256xf32>, vector<1x256xf32> -> vector<1x256xf32>
    %243 = arith.addf %241, %242 : vector<1x256xf32>
    %244 = vector.extract_strided_slice %243 {offsets = [0, 0], sizes = [1, 192], strides = [1, 1]} : vector<1x256xf32> to vector<1x192xf32>
    %245 = arith.negf %244 : vector<1x192xf32>
    %246 = math.exp %245 : vector<1x192xf32>
    %cst_95 = arith.constant 1.000000e+00 : f32
    %247 = vector.broadcast %cst_95 : f32 to vector<1x192xf32>
    %248 = arith.addf %247, %246 : vector<1x192xf32>
    %249 = arith.divf %247, %248 : vector<1x192xf32>
    %250 = vector.extract_strided_slice %249 {offsets = [0, 0], sizes = [1, 64], strides = [1, 1]} : vector<1x192xf32> to vector<1x64xf32>
    %251 = vector.extract_strided_slice %249 {offsets = [0, 64], sizes = [1, 64], strides = [1, 1]} : vector<1x192xf32> to vector<1x64xf32>
    %252 = vector.extract_strided_slice %249 {offsets = [0, 128], sizes = [1, 64], strides = [1, 1]} : vector<1x192xf32> to vector<1x64xf32>
    %253 = vector.extract_strided_slice %243 {offsets = [0, 192], sizes = [1, 64], strides = [1, 1]} : vector<1x256xf32> to vector<1x64xf32>
    %254 = math.tanh %253 : vector<1x64xf32>
    %255 = arith.mulf %251, %234 : vector<1x64xf32>
    %256 = arith.mulf %250, %254 : vector<1x64xf32>
    %257 = arith.addf %255, %256 : vector<1x64xf32>
    %258 = math.tanh %257 : vector<1x64xf32>
    %259 = arith.mulf %252, %258 : vector<1x64xf32>
    %260 = vector.extract_strided_slice %259 {offsets = [0, 0], sizes = [1, 32], strides = [1, 1]} : vector<1x64xf32> to vector<1x32xf32>
    %c1_96 = arith.constant 1 : index
    %c32_97 = arith.constant 32 : index
    %261 = vector.load %arg3[%c1_96, %c32_97] : memref<8x128xf32, #tpu.memory_space<vmem>>, vector<1x32xf32>
    tpu.vector_store %arg3[%c1_96, %c32_97], %260 {strides = array<i32>} : memref<8x128xf32, #tpu.memory_space<vmem>>, vector<1x32xf32>,
    %262 = vector.extract_strided_slice %259 {offsets = [0, 32], sizes = [1, 32], strides = [1, 1]} : vector<1x64xf32> to vector<1x32xf32>
    %c6_98 = arith.constant 6 : index
    %c96_99 = arith.constant 96 : index
    %263 = vector.load %arg3[%c6_98, %c96_99] : memref<8x128xf32, #tpu.memory_space<vmem>>, vector<1x32xf32>
    tpu.vector_store %arg3[%c6_98, %c96_99], %262 {strides = array<i32>} : memref<8x128xf32, #tpu.memory_space<vmem>>, vector<1x32xf32>,
    %264 = vector.extract_strided_slice %215 {offsets = [2, 0], sizes = [1, 256], strides = [1, 1]} : vector<8x256xf32> to vector<1x256xf32>
    %cst_100 = arith.constant dense<0.000000e+00> : vector<1x256xf32>
    %265 = tpu.matmul %259, %210, %cst_100 {dimension_numbers = #tpu.dot_dimension_numbers<[1], [0], [0], [1], [0, 0, 1, 1], [], []>} : vector<1x64xf32>, vector<64x256xf32>, vector<1x256xf32> -> vector<1x256xf32>
    %266 = arith.addf %264, %265 : vector<1x256xf32>
    %267 = vector.extract_strided_slice %266 {offsets = [0, 0], sizes = [1, 192], strides = [1, 1]} : vector<1x256xf32> to vector<1x192xf32>
    %268 = arith.negf %267 : vector<1x192xf32>
    %269 = math.exp %268 : vector<1x192xf32>
    %cst_101 = arith.constant 1.000000e+00 : f32
    %270 = vector.broadcast %cst_101 : f32 to vector<1x192xf32>
    %271 = arith.addf %270, %269 : vector<1x192xf32>
    %272 = arith.divf %270, %271 : vector<1x192xf32>
    %273 = vector.extract_strided_slice %272 {offsets = [0, 0], sizes = [1, 64], strides = [1, 1]} : vector<1x192xf32> to vector<1x64xf32>
    %274 = vector.extract_strided_slice %272 {offsets = [0, 64], sizes = [1, 64], strides = [1, 1]} : vector<1x192xf32> to vector<1x64xf32>
    %275 = vector.extract_strided_slice %272 {offsets = [0, 128], sizes = [1, 64], strides = [1, 1]} : vector<1x192xf32> to vector<1x64xf32>
    %276 = vector.extract_strided_slice %266 {offsets = [0, 192], sizes = [1, 64], strides = [1, 1]} : vector<1x256xf32> to vector<1x64xf32>
    %277 = math.tanh %276 : vector<1x64xf32>
    %278 = arith.mulf %274, %257 : vector<1x64xf32>
    %279 = arith.mulf %273, %277 : vector<1x64xf32>
    %280 = arith.addf %278, %279 : vector<1x64xf32>
    %281 = math.tanh %280 : vector<1x64xf32>
    %282 = arith.mulf %275, %281 : vector<1x64xf32>
    %283 = vector.extract_strided_slice %282 {offsets = [0, 0], sizes = [1, 32], strides = [1, 1]} : vector<1x64xf32> to vector<1x32xf32>
    %c2_102 = arith.constant 2 : index
    %c32_103 = arith.constant 32 : index
    %284 = vector.load %arg3[%c2_102, %c32_103] : memref<8x128xf32, #tpu.memory_space<vmem>>, vector<1x32xf32>
    tpu.vector_store %arg3[%c2_102, %c32_103], %283 {strides = array<i32>} : memref<8x128xf32, #tpu.memory_space<vmem>>, vector<1x32xf32>,
    %285 = vector.extract_strided_slice %282 {offsets = [0, 32], sizes = [1, 32], strides = [1, 1]} : vector<1x64xf32> to vector<1x32xf32>
    %c5_104 = arith.constant 5 : index
    %c96_105 = arith.constant 96 : index
    %286 = vector.load %arg3[%c5_104, %c96_105] : memref<8x128xf32, #tpu.memory_space<vmem>>, vector<1x32xf32>
    tpu.vector_store %arg3[%c5_104, %c96_105], %285 {strides = array<i32>} : memref<8x128xf32, #tpu.memory_space<vmem>>, vector<1x32xf32>,
    %287 = vector.extract_strided_slice %215 {offsets = [3, 0], sizes = [1, 256], strides = [1, 1]} : vector<8x256xf32> to vector<1x256xf32>
    %cst_106 = arith.constant dense<0.000000e+00> : vector<1x256xf32>
    %288 = tpu.matmul %282, %210, %cst_106 {dimension_numbers = #tpu.dot_dimension_numbers<[1], [0], [0], [1], [0, 0, 1, 1], [], []>} : vector<1x64xf32>, vector<64x256xf32>, vector<1x256xf32> -> vector<1x256xf32>
    %289 = arith.addf %287, %288 : vector<1x256xf32>
    %290 = vector.extract_strided_slice %289 {offsets = [0, 0], sizes = [1, 192], strides = [1, 1]} : vector<1x256xf32> to vector<1x192xf32>
    %291 = arith.negf %290 : vector<1x192xf32>
    %292 = math.exp %291 : vector<1x192xf32>
    %cst_107 = arith.constant 1.000000e+00 : f32
    %293 = vector.broadcast %cst_107 : f32 to vector<1x192xf32>
    %294 = arith.addf %293, %292 : vector<1x192xf32>
    %295 = arith.divf %293, %294 : vector<1x192xf32>
    %296 = vector.extract_strided_slice %295 {offsets = [0, 0], sizes = [1, 64], strides = [1, 1]} : vector<1x192xf32> to vector<1x64xf32>
    %297 = vector.extract_strided_slice %295 {offsets = [0, 64], sizes = [1, 64], strides = [1, 1]} : vector<1x192xf32> to vector<1x64xf32>
    %298 = vector.extract_strided_slice %295 {offsets = [0, 128], sizes = [1, 64], strides = [1, 1]} : vector<1x192xf32> to vector<1x64xf32>
    %299 = vector.extract_strided_slice %289 {offsets = [0, 192], sizes = [1, 64], strides = [1, 1]} : vector<1x256xf32> to vector<1x64xf32>
    %300 = math.tanh %299 : vector<1x64xf32>
    %301 = arith.mulf %297, %280 : vector<1x64xf32>
    %302 = arith.mulf %296, %300 : vector<1x64xf32>
    %303 = arith.addf %301, %302 : vector<1x64xf32>
    %304 = math.tanh %303 : vector<1x64xf32>
    %305 = arith.mulf %298, %304 : vector<1x64xf32>
    %306 = vector.extract_strided_slice %305 {offsets = [0, 0], sizes = [1, 32], strides = [1, 1]} : vector<1x64xf32> to vector<1x32xf32>
    %c3_108 = arith.constant 3 : index
    %c32_109 = arith.constant 32 : index
    %307 = vector.load %arg3[%c3_108, %c32_109] : memref<8x128xf32, #tpu.memory_space<vmem>>, vector<1x32xf32>
    tpu.vector_store %arg3[%c3_108, %c32_109], %306 {strides = array<i32>} : memref<8x128xf32, #tpu.memory_space<vmem>>, vector<1x32xf32>,
    %308 = vector.extract_strided_slice %305 {offsets = [0, 32], sizes = [1, 32], strides = [1, 1]} : vector<1x64xf32> to vector<1x32xf32>
    %c4_110 = arith.constant 4 : index
    %c96_111 = arith.constant 96 : index
    %309 = vector.load %arg3[%c4_110, %c96_111] : memref<8x128xf32, #tpu.memory_space<vmem>>, vector<1x32xf32>
    tpu.vector_store %arg3[%c4_110, %c96_111], %308 {strides = array<i32>} : memref<8x128xf32, #tpu.memory_space<vmem>>, vector<1x32xf32>,
    %310 = vector.extract_strided_slice %215 {offsets = [4, 0], sizes = [1, 256], strides = [1, 1]} : vector<8x256xf32> to vector<1x256xf32>
    %cst_112 = arith.constant dense<0.000000e+00> : vector<1x256xf32>
    %311 = tpu.matmul %305, %210, %cst_112 {dimension_numbers = #tpu.dot_dimension_numbers<[1], [0], [0], [1], [0, 0, 1, 1], [], []>} : vector<1x64xf32>, vector<64x256xf32>, vector<1x256xf32> -> vector<1x256xf32>
    %312 = arith.addf %310, %311 : vector<1x256xf32>
    %313 = vector.extract_strided_slice %312 {offsets = [0, 0], sizes = [1, 192], strides = [1, 1]} : vector<1x256xf32> to vector<1x192xf32>
    %314 = arith.negf %313 : vector<1x192xf32>
    %315 = math.exp %314 : vector<1x192xf32>
    %cst_113 = arith.constant 1.000000e+00 : f32
    %316 = vector.broadcast %cst_113 : f32 to vector<1x192xf32>
    %317 = arith.addf %316, %315 : vector<1x192xf32>
    %318 = arith.divf %316, %317 : vector<1x192xf32>
    %319 = vector.extract_strided_slice %318 {offsets = [0, 0], sizes = [1, 64], strides = [1, 1]} : vector<1x192xf32> to vector<1x64xf32>
    %320 = vector.extract_strided_slice %318 {offsets = [0, 64], sizes = [1, 64], strides = [1, 1]} : vector<1x192xf32> to vector<1x64xf32>
    %321 = vector.extract_strided_slice %318 {offsets = [0, 128], sizes = [1, 64], strides = [1, 1]} : vector<1x192xf32> to vector<1x64xf32>
    %322 = vector.extract_strided_slice %312 {offsets = [0, 192], sizes = [1, 64], strides = [1, 1]} : vector<1x256xf32> to vector<1x64xf32>
    %323 = math.tanh %322 : vector<1x64xf32>
    %324 = arith.mulf %320, %303 : vector<1x64xf32>
    %325 = arith.mulf %319, %323 : vector<1x64xf32>
    %326 = arith.addf %324, %325 : vector<1x64xf32>
    %327 = math.tanh %326 : vector<1x64xf32>
    %328 = arith.mulf %321, %327 : vector<1x64xf32>
    %329 = vector.extract_strided_slice %328 {offsets = [0, 0], sizes = [1, 32], strides = [1, 1]} : vector<1x64xf32> to vector<1x32xf32>
    %c4_114 = arith.constant 4 : index
    %c32_115 = arith.constant 32 : index
    %330 = vector.load %arg3[%c4_114, %c32_115] : memref<8x128xf32, #tpu.memory_space<vmem>>, vector<1x32xf32>
    tpu.vector_store %arg3[%c4_114, %c32_115], %329 {strides = array<i32>} : memref<8x128xf32, #tpu.memory_space<vmem>>, vector<1x32xf32>,
    %331 = vector.extract_strided_slice %328 {offsets = [0, 32], sizes = [1, 32], strides = [1, 1]} : vector<1x64xf32> to vector<1x32xf32>
    %c3_116 = arith.constant 3 : index
    %c96_117 = arith.constant 96 : index
    %332 = vector.load %arg3[%c3_116, %c96_117] : memref<8x128xf32, #tpu.memory_space<vmem>>, vector<1x32xf32>
    tpu.vector_store %arg3[%c3_116, %c96_117], %331 {strides = array<i32>} : memref<8x128xf32, #tpu.memory_space<vmem>>, vector<1x32xf32>,
    %333 = vector.extract_strided_slice %215 {offsets = [5, 0], sizes = [1, 256], strides = [1, 1]} : vector<8x256xf32> to vector<1x256xf32>
    %cst_118 = arith.constant dense<0.000000e+00> : vector<1x256xf32>
    %334 = tpu.matmul %328, %210, %cst_118 {dimension_numbers = #tpu.dot_dimension_numbers<[1], [0], [0], [1], [0, 0, 1, 1], [], []>} : vector<1x64xf32>, vector<64x256xf32>, vector<1x256xf32> -> vector<1x256xf32>
    %335 = arith.addf %333, %334 : vector<1x256xf32>
    %336 = vector.extract_strided_slice %335 {offsets = [0, 0], sizes = [1, 192], strides = [1, 1]} : vector<1x256xf32> to vector<1x192xf32>
    %337 = arith.negf %336 : vector<1x192xf32>
    %338 = math.exp %337 : vector<1x192xf32>
    %cst_119 = arith.constant 1.000000e+00 : f32
    %339 = vector.broadcast %cst_119 : f32 to vector<1x192xf32>
    %340 = arith.addf %339, %338 : vector<1x192xf32>
    %341 = arith.divf %339, %340 : vector<1x192xf32>
    %342 = vector.extract_strided_slice %341 {offsets = [0, 0], sizes = [1, 64], strides = [1, 1]} : vector<1x192xf32> to vector<1x64xf32>
    %343 = vector.extract_strided_slice %341 {offsets = [0, 64], sizes = [1, 64], strides = [1, 1]} : vector<1x192xf32> to vector<1x64xf32>
    %344 = vector.extract_strided_slice %341 {offsets = [0, 128], sizes = [1, 64], strides = [1, 1]} : vector<1x192xf32> to vector<1x64xf32>
    %345 = vector.extract_strided_slice %335 {offsets = [0, 192], sizes = [1, 64], strides = [1, 1]} : vector<1x256xf32> to vector<1x64xf32>
    %346 = math.tanh %345 : vector<1x64xf32>
    %347 = arith.mulf %343, %326 : vector<1x64xf32>
    %348 = arith.mulf %342, %346 : vector<1x64xf32>
    %349 = arith.addf %347, %348 : vector<1x64xf32>
    %350 = math.tanh %349 : vector<1x64xf32>
    %351 = arith.mulf %344, %350 : vector<1x64xf32>
    %352 = vector.extract_strided_slice %351 {offsets = [0, 0], sizes = [1, 32], strides = [1, 1]} : vector<1x64xf32> to vector<1x32xf32>
    %c5_120 = arith.constant 5 : index
    %c32_121 = arith.constant 32 : index
    %353 = vector.load %arg3[%c5_120, %c32_121] : memref<8x128xf32, #tpu.memory_space<vmem>>, vector<1x32xf32>
    tpu.vector_store %arg3[%c5_120, %c32_121], %352 {strides = array<i32>} : memref<8x128xf32, #tpu.memory_space<vmem>>, vector<1x32xf32>,
    %354 = vector.extract_strided_slice %351 {offsets = [0, 32], sizes = [1, 32], strides = [1, 1]} : vector<1x64xf32> to vector<1x32xf32>
    %c2_122 = arith.constant 2 : index
    %c96_123 = arith.constant 96 : index
    %355 = vector.load %arg3[%c2_122, %c96_123] : memref<8x128xf32, #tpu.memory_space<vmem>>, vector<1x32xf32>
    tpu.vector_store %arg3[%c2_122, %c96_123], %354 {strides = array<i32>} : memref<8x128xf32, #tpu.memory_space<vmem>>, vector<1x32xf32>,
    %356 = vector.extract_strided_slice %215 {offsets = [6, 0], sizes = [1, 256], strides = [1, 1]} : vector<8x256xf32> to vector<1x256xf32>
    %cst_124 = arith.constant dense<0.000000e+00> : vector<1x256xf32>
    %357 = tpu.matmul %351, %210, %cst_124 {dimension_numbers = #tpu.dot_dimension_numbers<[1], [0], [0], [1], [0, 0, 1, 1], [], []>} : vector<1x64xf32>, vector<64x256xf32>, vector<1x256xf32> -> vector<1x256xf32>
    %358 = arith.addf %356, %357 : vector<1x256xf32>
    %359 = vector.extract_strided_slice %358 {offsets = [0, 0], sizes = [1, 192], strides = [1, 1]} : vector<1x256xf32> to vector<1x192xf32>
    %360 = arith.negf %359 : vector<1x192xf32>
    %361 = math.exp %360 : vector<1x192xf32>
    %cst_125 = arith.constant 1.000000e+00 : f32
    %362 = vector.broadcast %cst_125 : f32 to vector<1x192xf32>
    %363 = arith.addf %362, %361 : vector<1x192xf32>
    %364 = arith.divf %362, %363 : vector<1x192xf32>
    %365 = vector.extract_strided_slice %364 {offsets = [0, 0], sizes = [1, 64], strides = [1, 1]} : vector<1x192xf32> to vector<1x64xf32>
    %366 = vector.extract_strided_slice %364 {offsets = [0, 64], sizes = [1, 64], strides = [1, 1]} : vector<1x192xf32> to vector<1x64xf32>
    %367 = vector.extract_strided_slice %364 {offsets = [0, 128], sizes = [1, 64], strides = [1, 1]} : vector<1x192xf32> to vector<1x64xf32>
    %368 = vector.extract_strided_slice %358 {offsets = [0, 192], sizes = [1, 64], strides = [1, 1]} : vector<1x256xf32> to vector<1x64xf32>
    %369 = math.tanh %368 : vector<1x64xf32>
    %370 = arith.mulf %366, %349 : vector<1x64xf32>
    %371 = arith.mulf %365, %369 : vector<1x64xf32>
    %372 = arith.addf %370, %371 : vector<1x64xf32>
    %373 = math.tanh %372 : vector<1x64xf32>
    %374 = arith.mulf %367, %373 : vector<1x64xf32>
    %375 = vector.extract_strided_slice %374 {offsets = [0, 0], sizes = [1, 32], strides = [1, 1]} : vector<1x64xf32> to vector<1x32xf32>
    %c6_126 = arith.constant 6 : index
    %c32_127 = arith.constant 32 : index
    %376 = vector.load %arg3[%c6_126, %c32_127] : memref<8x128xf32, #tpu.memory_space<vmem>>, vector<1x32xf32>
    tpu.vector_store %arg3[%c6_126, %c32_127], %375 {strides = array<i32>} : memref<8x128xf32, #tpu.memory_space<vmem>>, vector<1x32xf32>,
    %377 = vector.extract_strided_slice %374 {offsets = [0, 32], sizes = [1, 32], strides = [1, 1]} : vector<1x64xf32> to vector<1x32xf32>
    %c1_128 = arith.constant 1 : index
    %c96_129 = arith.constant 96 : index
    %378 = vector.load %arg3[%c1_128, %c96_129] : memref<8x128xf32, #tpu.memory_space<vmem>>, vector<1x32xf32>
    tpu.vector_store %arg3[%c1_128, %c96_129], %377 {strides = array<i32>} : memref<8x128xf32, #tpu.memory_space<vmem>>, vector<1x32xf32>,
    %379 = vector.extract_strided_slice %215 {offsets = [7, 0], sizes = [1, 256], strides = [1, 1]} : vector<8x256xf32> to vector<1x256xf32>
    %cst_130 = arith.constant dense<0.000000e+00> : vector<1x256xf32>
    %380 = tpu.matmul %374, %210, %cst_130 {dimension_numbers = #tpu.dot_dimension_numbers<[1], [0], [0], [1], [0, 0, 1, 1], [], []>} : vector<1x64xf32>, vector<64x256xf32>, vector<1x256xf32> -> vector<1x256xf32>
    %381 = arith.addf %379, %380 : vector<1x256xf32>
    %382 = vector.extract_strided_slice %381 {offsets = [0, 0], sizes = [1, 192], strides = [1, 1]} : vector<1x256xf32> to vector<1x192xf32>
    %383 = arith.negf %382 : vector<1x192xf32>
    %384 = math.exp %383 : vector<1x192xf32>
    %cst_131 = arith.constant 1.000000e+00 : f32
    %385 = vector.broadcast %cst_131 : f32 to vector<1x192xf32>
    %386 = arith.addf %385, %384 : vector<1x192xf32>
    %387 = arith.divf %385, %386 : vector<1x192xf32>
    %388 = vector.extract_strided_slice %387 {offsets = [0, 0], sizes = [1, 64], strides = [1, 1]} : vector<1x192xf32> to vector<1x64xf32>
    %389 = vector.extract_strided_slice %387 {offsets = [0, 64], sizes = [1, 64], strides = [1, 1]} : vector<1x192xf32> to vector<1x64xf32>
    %390 = vector.extract_strided_slice %387 {offsets = [0, 128], sizes = [1, 64], strides = [1, 1]} : vector<1x192xf32> to vector<1x64xf32>
    %391 = vector.extract_strided_slice %381 {offsets = [0, 192], sizes = [1, 64], strides = [1, 1]} : vector<1x256xf32> to vector<1x64xf32>
    %392 = math.tanh %391 : vector<1x64xf32>
    %393 = arith.mulf %389, %372 : vector<1x64xf32>
    %394 = arith.mulf %388, %392 : vector<1x64xf32>
    %395 = arith.addf %393, %394 : vector<1x64xf32>
    %396 = math.tanh %395 : vector<1x64xf32>
    %397 = arith.mulf %390, %396 : vector<1x64xf32>
    %398 = vector.extract_strided_slice %397 {offsets = [0, 0], sizes = [1, 32], strides = [1, 1]} : vector<1x64xf32> to vector<1x32xf32>
    %c7_132 = arith.constant 7 : index
    %c32_133 = arith.constant 32 : index
    %399 = vector.load %arg3[%c7_132, %c32_133] : memref<8x128xf32, #tpu.memory_space<vmem>>, vector<1x32xf32>
    tpu.vector_store %arg3[%c7_132, %c32_133], %398 {strides = array<i32>} : memref<8x128xf32, #tpu.memory_space<vmem>>, vector<1x32xf32>,
    %400 = vector.extract_strided_slice %397 {offsets = [0, 32], sizes = [1, 32], strides = [1, 1]} : vector<1x64xf32> to vector<1x32xf32>
    %c0_134 = arith.constant 0 : index
    %c96_135 = arith.constant 96 : index
    %401 = vector.load %arg3[%c0_134, %c96_135] : memref<8x128xf32, #tpu.memory_space<vmem>>, vector<1x32xf32>
    tpu.vector_store %arg3[%c0_134, %c96_135], %400 {strides = array<i32>} : memref<8x128xf32, #tpu.memory_space<vmem>>, vector<1x32xf32>,
    %c0_136 = arith.constant 0 : index
    %c0_137 = arith.constant 0 : index
    %402 = vector.load %arg4[%c0_136, %c0_137] : memref<8x128xf32, #tpu.memory_space<vmem>>, vector<8x32xf32>
    %c0_138 = arith.constant 0 : index
    %c0_139 = arith.constant 0 : index
    %403 = vector.load %arg3[%c0_138, %c0_139] : memref<8x128xf32, #tpu.memory_space<vmem>>, vector<8x32xf32>
    tpu.vector_store %arg3[%c0_138, %c0_139], %402 {strides = array<i32>} : memref<8x128xf32, #tpu.memory_space<vmem>>, vector<8x32xf32>,
    %c0_140 = arith.constant 0 : index
    %c32_141 = arith.constant 32 : index
    %404 = vector.load %arg4[%c0_140, %c32_141] : memref<8x128xf32, #tpu.memory_space<vmem>>, vector<8x32xf32>
    %c0_142 = arith.constant 0 : index
    %c64_143 = arith.constant 64 : index
    %405 = vector.load %arg3[%c0_142, %c64_143] : memref<8x128xf32, #tpu.memory_space<vmem>>, vector<8x32xf32>
    tpu.vector_store %arg3[%c0_142, %c64_143], %404 {strides = array<i32>} : memref<8x128xf32, #tpu.memory_space<vmem>>, vector<8x32xf32>,
    return
  }
}

</mosaic_0001>

<bundles_post_ra>
// kernel: encode.1
= control target key start
LH: loop header
LB: loop body
LE: loop exit
PB: predicated region body
PF: predicated region fallthrough
CT: control target
= control target key end

     0   :  { %8 = vsyncpa [#allocation4], 0  ;;  %s3478_s0 = inlined_call_operand.vmem [shape: f32[8,64], index: 0, kind: input, shape index: {}]   ;;  %s3479_s1 = inlined_call_operand.vmem [shape: f32[129,256], index: 1, kind: input, shape index: {}]   ;;  %s3480_s2 = inlined_call_operand.hbm [shape: f32[193,256], index: 2, kind: input, shape index: {}]   ;;  %s3481_s3 = inlined_call_operand.hbm [shape: f32[8,128], index: 3, kind: output, shape index: {}]  }
   0x1   :  { %9 = vsyncpa [#allocation5], 0  ;;  %s2892_s12 = smov [#allocation3]   ;;  %s2844_s16 = scalar_lea.hbm %s3480_s2, 6400 }
   0x2   :  { %s19_s13 = sshll.u32 %s2892_s12, 4  ;;  %p2845_p0 = scmp.ne.s32.totalorder %s3480_s2, %s2844_s16  ;;  %s20_s13 = int_to_ptr.vmem [resolvable:$true] %s19_s13 }
   0x3   :  { %p2848_p1 = scmp.lt.u32.totalorder %s2844_s16, %s3480_s2 }
   0x5   :  { %p2850_p2 = pnand %p2848_p1, %p2845_p0 }
   0x7   :  { %2853 = shalt.err (!%p2850_p2)
}
   0x8   :  { %s2854_s21 = scalar_lea.vmem %s20_s13, 6400  ;;  %p2859_p4 = scmp.lt.s32.totalorder %s20_s13, %s20_s13 }
   0x9   :  { %p2855_p3 = scmp.ne.s32.totalorder %s20_s13, %s2854_s21  ;;  %p2860_p5 = scmp.lt.s32.totalorder %s2854_s21, %s2854_s21 }
   0xb   :  { %p2861_p6 = por %p2860_p5, %p2859_p4 }
   0xd   :  { %p2862_p7 = pnand %p2861_p6, %p2855_p3 }
   0xf   :  { %2865 = shalt.err (!%p2862_p7)
}
  0x10   :  { %s2893_s22 = smov 256   ;;  %s2894_s23 = smov 16  }
  0x11   :  { %25 = dma.hbm_to_vmem [thread:$0]  %s3480_s2, 6400, %s20_s13, [#allocation4], %s2893_s22, %s2893_s22, %s2894_s23  }
  0x12   :  { %2888 = dma.done.wait [#allocation4], 6400  }
  0x13   :  { %2889 = vsyncadd [#allocation4], 4294960896  ;;  %v2895_v0 = vmov 0.0   ;;  %v30_v1 = vld [vmem:[%s3479_s1 + $0x8] sm:$0xff]  ;;  %v32_v2 = vld [vmem:[%s3479_s1 + $0x18] sm:$0xff]  ;;  %vm75_vm0 = vcmask 523264   ;;  %v65_v50 = vlaneseq }
  0x14   :  { %143 = vmatprep.mubr.f32.mxu0 %v2895_v0  ;;  %217 = vmatprep.mubr.f32.mxu1 %v2895_v0  ;;  %v29_v3 = vld [vmem:[%s3479_s1] sm:$0xff]  ;;  %v2341_v4 = vpack.c.bf16 %v32_v2, %v30_v1  ;;  %v31_v5 = vld [vmem:[%s3479_s1 + $0x10] sm:$0xff]  ;;  %v46_v6 = vld [vmem:[%s3479_s1 + $0x88] sm:$0xff]  ;;  %s2896_s9 = smov 64   ;;  %vm256_vm1 = vcmask 253952   ;;  %vm258_vm2 = vcmask 516352  }
  0x15   :  { %v48_v7 = vld [vmem:[%s3479_s1 + $0x98] sm:$0xff]  ;;  %v2343_v8 = vpack.c.bf16 %v31_v5, %v29_v3  ;;  %v45_v10 = vld [vmem:[%s3479_s1 + $0x80] sm:$0xff]  ;;  %v47_v11 = vld [vmem:[%s3479_s1 + $0x90] sm:$0xff]  ;;  %v3078_v51 = vshrl.u32 %v65_v50, 7  ;;  %vm382_vm3 = vcmask 254977   ;;  %vm384_vm4 = vcmask 517377  }
  0x16   :  { %v2951_v9 = vpack.c.bf16 %v48_v7, %v46_v6  ;;  %v34_v12 = vld [vmem:[%s3479_s1 + $0x28] sm:$0xff]  ;;  %2342 = vmatprep.subr.bf16.mxu0 %v2341_v4  ;;  %v2962_v13 = vpack.c.bf16 %v47_v11, %v45_v10  ;;  %v36_v14 = vld [vmem:[%s3479_s1 + $0x38] sm:$0xff]  ;;  %v33_v15 = vld [vmem:[%s3479_s1 + $0x20] sm:$0xff]  ;;  %vm509_vm5 = vcmask 256002   ;;  %vm511_vm6 = vcmask 518402   ;;  %s2898_s10 = smov [#allocation6]  }
  0x17   :  { %v35_v16 = vld [vmem:[%s3479_s1 + $0x30] sm:$0xff]  ;;  %2344 = vmatpush1.bf16.msra.mxu0 %v2343_v8  ;;  %v2345_v17 = vpack.c.bf16 %v36_v14, %v34_v12  ;;  %v50_v19 = vld [vmem:[%s3479_s1 + $0xa8] sm:$0xff]  ;;  %v52_v20 = vld [vmem:[%s3479_s1 + $0xb8] sm:$0xff]  ;;  %v71_v52 = vsub.s32 1, %v3078_v51  ;;  %v67_v62 = vsub.s32 0, %v3078_v51  ;;  %vm636_vm7 = vcmask 257027  }
  0x18   :  { %2358 = vmatprep.subr.bf16.mxu1 %v2951_v9  ;;  %v2347_v18 = vpack.c.bf16 %v35_v16, %v33_v15  ;;  %v49_v21 = vld [vmem:[%s3479_s1 + $0xa0] sm:$0xff]  ;;  %v2984_v22 = vpack.c.bf16 %v52_v20, %v50_v19  ;;  %v51_v23 = vld [vmem:[%s3479_s1 + $0xb0] sm:$0xff]  ;;  %v38_v24 = vld [vmem:[%s3479_s1 + $0x48] sm:$0xff]  ;;  %vm638_vm8 = vcmask 519427   ;;  %vm264_vm9 = vcmask 778752   ;;  %s2284_s11 = sshll.u32 %s2898_s10, 4  ;;  %s2285_s11 = int_to_ptr.vmem [resolvable:$true] %s2284_s11 }
  0x19   :  { %2360 = vmatpush1.bf16.msra.mxu1 %v2962_v13  ;;  %v40_v25 = vld [vmem:[%s3479_s1 + $0x58] sm:$0xff]  ;;  %2346 = vmatprep.subr.bf16.mxu0 %v2345_v17  ;;  %v2995_v26 = vpack.c.bf16 %v51_v23, %v49_v21  ;;  %v37_v28 = vld [vmem:[%s3479_s1 + $0x40] sm:$0xff]  ;;  %v39_v29 = vld [vmem:[%s3479_s1 + $0x50] sm:$0xff]  ;;  %vm3485_vm10 = vcmask 1041152   ;;  %vm517_vm11 = vcmask 780802   ;;  %vm3483_vm12 = vcmask 1043202   ;;  %p2871_p9 = scmp.lt.s32.totalorder %s2285_s11, %s2285_s11 }
  0x1a   :  { %v2349_v27 = vpack.c.bf16 %v40_v25, %v38_v24  ;;  %v54_v30 = vld [vmem:[%s3479_s1 + $0xc8] sm:$0xff]  ;;  %2362 = vmatprep.subr.bf16.mxu1 %v2984_v22  ;;  %v56_v31 = vld [vmem:[%s3479_s1 + $0xd8] sm:$0xff]  ;;  %v53_v32 = vld [vmem:[%s3479_s1 + $0xc0] sm:$0xff]  ;;  %v2351_v34 = vpack.c.bf16 %v39_v29, %v37_v28  ;;  %vm890_vm13 = vcmask 259077   ;;  %vm3482_vm14 = vcmask 521477   ;;  %s2866_s12 = scalar_lea.vmem %s2285_s11, 128 }
  0x1b   :  { %v55_v33 = vld [vmem:[%s3479_s1 + $0xd0] sm:$0xff]  ;;  %2348 = vmatpush1.bf16.msra.mxu0 %v2347_v18  ;;  %v3016_v35 = vpack.c.bf16 %v56_v31, %v54_v30  ;;  %v42_v36 = vld [vmem:[%s3479_s1 + $0x68] sm:$0xff]  ;;  %v44_v37 = vld [vmem:[%s3479_s1 + $0x78] sm:$0xff]  ;;  %vm1144_vm15 = vcmask 261127   ;;  %p2867_p8 = scmp.ne.s32.totalorder %s2285_s11, %s2866_s12  ;;  %p2872_p10 = scmp.lt.s32.totalorder %s2866_s12, %s2866_s12 }
  0x1c   :  { %v41_v38 = vld [vmem:[%s3479_s1 + $0x60] sm:$0xff]  ;;  %2350 = vmatprep.subr.bf16.mxu0 %v2349_v27  ;;  %v3028_v39 = vpack.c.bf16 %v55_v33, %v53_v32  ;;  %v2353_v40 = vpack.c.bf16 %v44_v37, %v42_v36  ;;  %v43_v41 = vld [vmem:[%s3479_s1 + $0x70] sm:$0xff]  ;;  %v58_v42 = vld [vmem:[%s3479_s1 + $0xe8] sm:$0xff] }
  0x1d   :  { %2364 = vmatpush1.bf16.msra.mxu1 %v2995_v26  ;;  %v60_v43 = vld [vmem:[%s3479_s1 + $0xf8] sm:$0xff]  ;;  %v57_v45 = vld [vmem:[%s3479_s1 + $0xe0] sm:$0xff]  ;;  %v59_v46 = vld [vmem:[%s3479_s1 + $0xf0] sm:$0xff]  ;;  %v2355_v47 = vpack.c.bf16 %v43_v41, %v41_v38  ;;  %p2873_p11 = por %p2872_p10, %p2871_p9 }
  0x1e   :  { %2366 = vmatprep.subr.bf16.mxu1 %v3016_v35  ;;  %v3040_v44 = vpack.c.bf16 %v60_v43, %v58_v42  ;;  %v3049_v48 = vpack.c.bf16 %v59_v46, %v57_v45  ;;  %v63_v49 = vld [vmem:[%s3478_s0] sm:$0xff] }
  0x1f   :  { %2352 = vmatpush1.bf16.msra.mxu0 %v2351_v34  ;;  %v2293_v53 = vld [vmem:[%s3479_s1 + $0x100] ss:$8 sm:$0x3]  ;;  %s2897_s1 = smov 32   ;;  %p2874_p12 = pnand %p2873_p11, %p2867_p8 }
  0x20   :  { %2354 = vmatprep.subr.bf16.mxu0 %v2353_v40  ;;  %v72_v54 = vrot.slane %v2293_v53, %v71_v52  ;;  %v68_v63 = vrot.slane %v2293_v53, %v67_v62 }
  0x21   :  { %2368 = vmatpush1.bf16.msra.mxu1 %v3028_v39 }
  0x22   :  { %2370 = vmatprep.subr.bf16.mxu1 %v3040_v44 }
  0x23   :  { %2356 = vmatpush1.bf16.msra.mxu0 %v2355_v47 }
  0x24   :  { %2374 = vmatprep.subr.bf16.mxu0 %v2951_v9 }
  0x25   :  { %2372 = vmatpush1.bf16.msra.mxu1 %v3049_v48 }
  0x26   :  { %2390 = vmatprep.subr.bf16.mxu1 %v2951_v9  ;;  %2294 = vmatmul.mubr.msk.f32.vlgmr.msra.gmra.mrb[0].mxu0 %vm75_vm0, %v63_v49 }
  0x27   :  { %2376 = vmatpush1.bf16.msra.mxu0 %v2962_v13  ;;  %334 = vmatprep.mubr.f32.mxu0 %v2895_v0 }
  0x28   :  { %218 = vmatmul.mubr.f32.vlgmr.msra.gmra.mrb[0].mxu1 %v2895_v0  ;;  %2378 = vmatprep.subr.bf16.mxu0 %v2984_v22 }
  0x29   :  { %2392 = vmatpush1.bf16.msra.mxu1 %v2962_v13  ;;  %461 = vmatprep.mubr.f32.mxu1 %v2895_v0 }
  0x2a   :  { %2394 = vmatprep.subr.bf16.mxu1 %v2984_v22 }
  0x2b   :  { %2380 = vmatpush1.bf16.msra.mxu0 %v2995_v26 }
  0x2c   :  { %2382 = vmatprep.subr.bf16.mxu0 %v3016_v35 }
  0x2d   :  { %2396 = vmatpush1.bf16.msra.mxu1 %v2995_v26 }
  0x2e   :  { %2398 = vmatprep.subr.bf16.mxu1 %v3016_v35 }
  0x2f   :  { %2384 = vmatpush1.bf16.msra.mxu0 %v3028_v39 }
  0x30   :  { %2386 = vmatprep.subr.bf16.mxu0 %v3040_v44 }
  0x31   :  { %2400 = vmatpush1.bf16.msra.mxu1 %v3028_v39 }
  0x32   :  { %2402 = vmatprep.subr.bf16.mxu1 %v3040_v44 }
  0x33   :  { %2388 = vmatpush1.bf16.msra.mxu0 %v3049_v48 }
  0x34   :  { %2406 = vmatprep.subr.bf16.mxu0 %v2951_v9 }
  0x35   :  { %2404 = vmatpush1.bf16.msra.mxu1 %v3049_v48 }
  0x36   :  { %2422 = vmatprep.subr.bf16.mxu1 %v2951_v9 }
  0xf9   :  { %v145_v55 = vpop.f32.mrb[0].mxu0 }
  0xfa   :  { %v147_v56 = vpop.f32.mrb[1].mxu0  ;;  %v3093_v1 = vadd.f32 %v145_v55, %v68_v63 }
  0xfb   :  { %v219_v57 = vpop.f32.mrb[0].mxu1  ;;  %v3086_v58 = vadd.f32 %v147_v56, %v72_v54 }
  0xfc   :  { %v221_v59 = vpop.f32.mrb[1].mxu1  ;;  %v224_v2 = vadd.f32 %v219_v57, %v3093_v1 }
  0xfd   :  { %v225_v60 = vadd.f32 %v221_v59, %v3086_v58 }
  0xfe   :  { %v2295_v3 = vmul.f32 -1.442695, %v224_v2 }
  0xff   :  { %2652 = vtanh.f32 %v225_v60  ;;  %v2296_v15 = vmul.f32 -1.442695, %v225_v60 }
 0x100   :  { %2654 = vpow2.f32 %v2295_v3 }
 0x109   :  { %v2653_v61 = vpop.eup %2652 }
 0x10a   :  { %241 = vrot.lane.b32.xlu0 %v2653_v61, %s2896_s9  ;;  %v2655_v4 = vpop.eup %2654 }
 0x10b   :  { %v232_v5 = vadd.f32 1.0, %v2655_v4 }
 0x10d   :  { %2656 = vrcp.f32 %v232_v5 }
 0x117   :  { %v2657_v6 = vpop.eup %2656 }
 0x118   :  { %v239_v10 = vmul.f32 0.0, %v2657_v6 }
 0x17c   :  { %v242_v7 = vpop.permute.xlu0 %241 }
 0x17d   :  { %v244_v8 = vmul.f32 %v2657_v6, %v242_v7 }
 0x17f   :  { %246 = vrot.lane.b32.xlu0 %v244_v8, %s2896_s9 }
 0x1f1   :  { %v247_v11 = vpop.permute.xlu0 %246 }
 0x1f2   :  { %v249_v12 = vadd.f32 %v247_v11, %v239_v10 }
 0x1f4   :  { %2658 = vtanh.f32 %v249_v12  ;;  %v363_v37 = vrot.slane %v249_v12, 7 }
 0x1f5   :  { %2660 = vpow2.f32 %v2296_v15 }
 0x1fe   :  { %v2659_v14 = vpop.eup %2658 }
 0x1ff   :  { %252 = vrot.lane.b32.xlu1 %v2659_v14, %s2896_s9  ;;  %v2661_v16 = vpop.eup %2660 }
 0x200   :  { %v233_v17 = vadd.f32 1.0, %v2661_v16 }
 0x202   :  { %2662 = vrcp.f32 %v233_v17 }
 0x20c   :  { %v2663_v18 = vpop.eup %2662 }
 0x271   :  { %v253_v19 = vpop.permute.xlu1 %252 }
 0x272   :  { %v3098_v20 = vmul.f32 %v2663_v18, %v253_v19 }
 0x274   :  { %2297 = vmatmul.mubr.msk.f32.vlgmr.msra.gmra.mrb[2].mxu0 %vm75_vm0, %v3098_v20  ;;  %257 = vst.msk [vmem:[#allocation2] sm:$0x1] %vm256_vm1, %v3098_v20  ;;  %vm3484_vm1 = vcmask 523527  }
 0x275   :  { %259 = vst.msk [vmem:[#allocation2 + $0x7] sm:$0x1] %vm258_vm2, %v3098_v20  ;;  %2408 = vmatpush1.bf16.msra.mxu0 %v2962_v13  ;;  %588 = vmatprep.mubr.f32.mxu0 %v2895_v0 }
 0x276   :  { %2410 = vmatprep.subr.bf16.mxu0 %v2984_v22 }
 0x279   :  { %2412 = vmatpush1.bf16.msra.mxu0 %v2995_v26 }
 0x27a   :  { %2414 = vmatprep.subr.bf16.mxu0 %v3016_v35 }
 0x27d   :  { %2416 = vmatpush1.bf16.msra.mxu0 %v3028_v39 }
 0x27e   :  { %2418 = vmatprep.subr.bf16.mxu0 %v3040_v44 }
 0x281   :  { %2420 = vmatpush1.bf16.msra.mxu0 %v3049_v48 }
 0x282   :  { %2438 = vmatprep.subr.bf16.mxu0 %v2951_v9 }
 0x347   :  { %v336_v21 = vpop.f32.mrb[2].mxu0 }
 0x348   :  { %v338_v23 = vpop.f32.mrb[3].mxu0  ;;  %v343_v28 = vrot.slane %v336_v21, 7 }
 0x349   :  { %v344_v24 = vrot.slane %v338_v23, 7 }
 0x34a   :  { %v347_v29 = vadd.f32 %v343_v28, %v3093_v1 }
 0x34b   :  { %v348_v25 = vadd.f32 %v344_v24, %v3086_v58 }
 0x34c   :  { %v2298_v30 = vmul.f32 -1.442695, %v347_v29 }
 0x34d   :  { %2664 = vtanh.f32 %v348_v25  ;;  %v2299_v43 = vmul.f32 -1.442695, %v348_v25 }
 0x34e   :  { %2666 = vpow2.f32 %v2298_v30 }
 0x357   :  { %v2665_v27 = vpop.eup %2664 }
 0x358   :  { %367 = vrot.lane.b32.xlu1 %v2665_v27, %s2896_s9  ;;  %v2667_v31 = vpop.eup %2666 }
 0x359   :  { %v355_v32 = vadd.f32 1.0, %v2667_v31 }
 0x35b   :  { %2668 = vrcp.f32 %v355_v32 }
 0x365   :  { %v2669_v33 = vpop.eup %2668 }
 0x366   :  { %v365_v38 = vmul.f32 %v2669_v33, %v363_v37 }
 0x3ca   :  { %v368_v34 = vpop.permute.xlu1 %367 }
 0x3cb   :  { %v370_v36 = vmul.f32 %v2669_v33, %v368_v34 }
 0x3cd   :  { %372 = vrot.lane.b32.xlu0 %v370_v36, %s2896_s9 }
 0x43f   :  { %v373_v40 = vpop.permute.xlu0 %372 }
 0x440   :  { %v375_v41 = vadd.f32 %v373_v40, %v365_v38 }
 0x442   :  { %2670 = vtanh.f32 %v375_v41  ;;  %v490_v7 = vrot.slane %v375_v41, 7 }
 0x443   :  { %2672 = vpow2.f32 %v2299_v43 }
 0x44c   :  { %v2671_v42 = vpop.eup %2670 }
 0x44d   :  { %378 = vrot.lane.b32.xlu1 %v2671_v42, %s2896_s9  ;;  %v2673_v45 = vpop.eup %2672 }
 0x44e   :  { %v356_v46 = vadd.f32 1.0, %v2673_v45 }
 0x450   :  { %2674 = vrcp.f32 %v356_v46 }
 0x45a   :  { %v2675_v47 = vpop.eup %2674 }
 0x4bf   :  { %v379_v49 = vpop.permute.xlu1 %378 }
 0x4c0   :  { %v3119_v50 = vmul.f32 %v2675_v47, %v379_v49 }
 0x4c2   :  { %v394_v53 = vrot.slane %v3119_v50, 1  ;;  %383 = vst.msk [vmem:[#allocation2] sm:$0x2] %vm382_vm3, %v3119_v50  ;;  %vm390_vm3 = vcmask 779777  }
 0x4c3   :  { %385 = vst.msk [vmem:[#allocation2 + $0x5] sm:$0x2] %vm384_vm4, %v3119_v50 }
 0x4c4   :  { %2300 = vmatmul.mubr.msk.f32.vlgmr.msra.gmra.mrb[2].mxu1 %vm75_vm0, %v394_v53 }
 0x4c5   :  { %2424 = vmatpush1.bf16.msra.mxu1 %v2962_v13  ;;  %715 = vmatprep.mubr.f32.mxu1 %v2895_v0 }
 0x4c6   :  { %2426 = vmatprep.subr.bf16.mxu1 %v2984_v22 }
 0x4c9   :  { %2428 = vmatpush1.bf16.msra.mxu1 %v2995_v26 }
 0x4ca   :  { %2430 = vmatprep.subr.bf16.mxu1 %v3016_v35 }
 0x4cd   :  { %2432 = vmatpush1.bf16.msra.mxu1 %v3028_v39 }
 0x4ce   :  { %2434 = vmatprep.subr.bf16.mxu1 %v3040_v44 }
 0x4d1   :  { %2436 = vmatpush1.bf16.msra.mxu1 %v3049_v48 }
 0x4d2   :  { %2454 = vmatprep.subr.bf16.mxu1 %v2951_v9 }
 0x597   :  { %v463_v54 = vpop.f32.mrb[2].mxu1 }
 0x598   :  { %v465_v55 = vpop.f32.mrb[3].mxu1  ;;  %v470_v60 = vrot.slane %v463_v54, 6 }
 0x599   :  { %v471_v56 = vrot.slane %v465_v55, 6 }
 0x59a   :  { %v474_v61 = vadd.f32 %v470_v60, %v3093_v1 }
 0x59b   :  { %v475_v57 = vadd.f32 %v471_v56, %v3086_v58 }
 0x59c   :  { %v2301_v63 = vmul.f32 -1.442695, %v474_v61 }
 0x59d   :  { %2676 = vtanh.f32 %v475_v57  ;;  %v2302_v14 = vmul.f32 -1.442695, %v475_v57 }
 0x59e   :  { %2678 = vpow2.f32 %v2301_v63 }
 0x5a7   :  { %v2677_v59 = vpop.eup %2676 }
 0x5a8   :  { %494 = vrot.lane.b32.xlu0 %v2677_v59, %s2896_s9  ;;  %v2679_v2 = vpop.eup %2678 }
 0x5a9   :  { %v482_v3 = vadd.f32 1.0, %v2679_v2 }
 0x5ab   :  { %2680 = vrcp.f32 %v482_v3 }
 0x5b5   :  { %v2681_v4 = vpop.eup %2680 }
 0x5b6   :  { %v492_v8 = vmul.f32 %v2681_v4, %v490_v7 }
 0x61a   :  { %v495_v5 = vpop.permute.xlu0 %494 }
 0x61b   :  { %v497_v6 = vmul.f32 %v2681_v4, %v495_v5 }
 0x61d   :  { %499 = vrot.lane.b32.xlu1 %v497_v6, %s2896_s9 }
 0x68f   :  { %v500_v10 = vpop.permute.xlu1 %499 }
 0x690   :  { %v502_v11 = vadd.f32 %v500_v10, %v492_v8 }
 0x692   :  { %2682 = vtanh.f32 %v502_v11  ;;  %v617_v37 = vrot.slane %v502_v11, 7 }
 0x693   :  { %2684 = vpow2.f32 %v2302_v14 }
 0x69c   :  { %v2683_v12 = vpop.eup %2682 }
 0x69d   :  { %505 = vrot.lane.b32.xlu0 %v2683_v12, %s2896_s9  ;;  %v2685_v15 = vpop.eup %2684 }
 0x69e   :  { %v483_v16 = vadd.f32 1.0, %v2685_v15 }
 0x6a0   :  { %2686 = vrcp.f32 %v483_v16 }
 0x6aa   :  { %v2687_v17 = vpop.eup %2686 }
 0x70f   :  { %v506_v18 = vpop.permute.xlu0 %505 }
 0x710   :  { %v3140_v19 = vmul.f32 %v2687_v17, %v506_v18 }
 0x712   :  { %v521_v21 = vrot.slane %v3140_v19, 2  ;;  %510 = vst.msk [vmem:[#allocation2] sm:$0x4] %vm509_vm5, %v3140_v19  ;;  %vm392_vm5 = vcmask 1042177  }
 0x713   :  { %512 = vst.msk [vmem:[#allocation2 + $0x3] sm:$0x4] %vm511_vm6, %v3140_v19 }
 0x714   :  { %2303 = vmatmul.mubr.msk.f32.vlgmr.msra.gmra.mrb[4].mxu0 %vm75_vm0, %v521_v21 }
 0x715   :  { %2440 = vmatpush1.bf16.msra.mxu0 %v2962_v13  ;;  %842 = vmatprep.mubr.f32.mxu0 %v2895_v0 }
 0x716   :  { %2442 = vmatprep.subr.bf16.mxu0 %v2984_v22 }
 0x719   :  { %2444 = vmatpush1.bf16.msra.mxu0 %v2995_v26 }
 0x71a   :  { %2446 = vmatprep.subr.bf16.mxu0 %v3016_v35 }
 0x71d   :  { %2448 = vmatpush1.bf16.msra.mxu0 %v3028_v39 }
 0x71e   :  { %2450 = vmatprep.subr.bf16.mxu0 %v3040_v44 }
 0x721   :  { %2452 = vmatpush1.bf16.msra.mxu0 %v3049_v48 }
 0x722   :  { %2470 = vmatprep.subr.bf16.mxu0 %v2951_v9 }
 0x7e7   :  { %v590_v23 = vpop.f32.mrb[4].mxu0 }
 0x7e8   :  { %v592_v24 = vpop.f32.mrb[5].mxu0  ;;  %v597_v29 = vrot.slane %v590_v23, 5 }
 0x7e9   :  { %v598_v25 = vrot.slane %v592_v24, 5 }
 0x7ea   :  { %v601_v30 = vadd.f32 %v597_v29, %v3093_v1 }
 0x7eb   :  { %v602_v27 = vadd.f32 %v598_v25, %v3086_v58 }
 0x7ec   :  { %v2304_v31 = vmul.f32 -1.442695, %v601_v30 }
 0x7ed   :  { %2688 = vtanh.f32 %v602_v27  ;;  %v2305_v43 = vmul.f32 -1.442695, %v602_v27 }
 0x7ee   :  { %2690 = vpow2.f32 %v2304_v31 }
 0x7f7   :  { %v2689_v28 = vpop.eup %2688 }
 0x7f8   :  { %621 = vrot.lane.b32.xlu1 %v2689_v28, %s2896_s9  ;;  %v2691_v32 = vpop.eup %2690 }
 0x7f9   :  { %v609_v33 = vadd.f32 1.0, %v2691_v32 }
 0x7fb   :  { %2692 = vrcp.f32 %v609_v33 }
 0x805   :  { %v2693_v34 = vpop.eup %2692 }
 0x806   :  { %v619_v38 = vmul.f32 %v2693_v34, %v617_v37 }
 0x86a   :  { %v622_v36 = vpop.permute.xlu1 %621 }
 0x86b   :  { %v624_v9 = vmul.f32 %v2693_v34, %v622_v36 }
 0x86d   :  { %626 = vrot.lane.b32.xlu0 %v624_v9, %s2896_s9 }
 0x8df   :  { %v627_v40 = vpop.permute.xlu0 %626 }
 0x8e0   :  { %v629_v41 = vadd.f32 %v627_v40, %v619_v38 }
 0x8e2   :  { %2694 = vtanh.f32 %v629_v41  ;;  %v744_v8 = vrot.slane %v629_v41, 7 }
 0x8e3   :  { %2696 = vpow2.f32 %v2305_v43 }
 0x8ec   :  { %v2695_v42 = vpop.eup %2694 }
 0x8ed   :  { %632 = vrot.lane.b32.xlu1 %v2695_v42, %s2896_s9  ;;  %v2697_v45 = vpop.eup %2696 }
 0x8ee   :  { %v610_v46 = vadd.f32 1.0, %v2697_v45 }
 0x8f0   :  { %2698 = vrcp.f32 %v610_v46 }
 0x8fa   :  { %v2699_v47 = vpop.eup %2698 }
 0x95f   :  { %v633_v49 = vpop.permute.xlu1 %632 }
 0x960   :  { %v3161_v53 = vmul.f32 %v2699_v47, %v633_v49 }
 0x962   :  { %v648_v54 = vrot.slane %v3161_v53, 3  ;;  %637 = vst.msk [vmem:[#allocation2] sm:$0x8] %vm636_vm7, %v3161_v53  ;;  %vm1017_vm7 = vcmask 260102  }
 0x963   :  { %639 = vst.msk [vmem:[#allocation2 + $0x1] sm:$0x8] %vm638_vm8, %v3161_v53 }
 0x964   :  { %2306 = vmatmul.mubr.msk.f32.vlgmr.msra.gmra.mrb[4].mxu1 %vm75_vm0, %v648_v54 }
 0x965   :  { %2456 = vmatpush1.bf16.msra.mxu1 %v2962_v13  ;;  %969 = vmatprep.mubr.f32.mxu1 %v2895_v0 }
 0x966   :  { %2458 = vmatprep.subr.bf16.mxu1 %v2984_v22 }
 0x969   :  { %2460 = vmatpush1.bf16.msra.mxu1 %v2995_v26 }
 0x96a   :  { %2462 = vmatprep.subr.bf16.mxu1 %v3016_v35 }
 0x96d   :  { %2464 = vmatpush1.bf16.msra.mxu1 %v3028_v39 }
 0x96e   :  { %2466 = vmatprep.subr.bf16.mxu1 %v3040_v44 }
 0x971   :  { %2468 = vmatpush1.bf16.msra.mxu1 %v3049_v48 }
 0xa37   :  { %v717_v55 = vpop.f32.mrb[4].mxu1 }
 0xa38   :  { %v719_v56 = vpop.f32.mrb[5].mxu1  ;;  %v724_v61 = vrot.slane %v717_v55, 4 }
 0xa39   :  { %v725_v57 = vrot.slane %v719_v56, 4 }
 0xa3a   :  { %v728_v63 = vadd.f32 %v724_v61, %v3093_v1 }
 0xa3b   :  { %v729_v59 = vadd.f32 %v725_v57, %v3086_v58 }
 0xa3c   :  { %v2307_v2 = vmul.f32 -1.442695, %v728_v63 }
 0xa3d   :  { %2700 = vtanh.f32 %v729_v59  ;;  %v2308_v15 = vmul.f32 -1.442695, %v729_v59 }
 0xa3e   :  { %2702 = vpow2.f32 %v2307_v2 }
 0xa47   :  { %v2701_v60 = vpop.eup %2700 }
 0xa48   :  { %748 = vrot.lane.b32.xlu0 %v2701_v60, %s2896_s9  ;;  %v2703_v3 = vpop.eup %2702 }
 0xa49   :  { %v736_v4 = vadd.f32 1.0, %v2703_v3 }
 0xa4b   :  { %2704 = vrcp.f32 %v736_v4 }
 0xa55   :  { %v2705_v5 = vpop.eup %2704 }
 0xa56   :  { %v746_v10 = vmul.f32 %v2705_v5, %v744_v8 }
 0xaba   :  { %v749_v6 = vpop.permute.xlu0 %748 }
 0xabb   :  { %v751_v7 = vmul.f32 %v2705_v5, %v749_v6 }
 0xabd   :  { %753 = vrot.lane.b32.xlu1 %v751_v7, %s2896_s9 }
 0xb2f   :  { %v754_v11 = vpop.permute.xlu1 %753 }
 0xb30   :  { %v756_v12 = vadd.f32 %v754_v11, %v746_v10 }
 0xb32   :  { %2706 = vtanh.f32 %v756_v12  ;;  %v871_v32 = vrot.slane %v756_v12, 7 }
 0xb33   :  { %2708 = vpow2.f32 %v2308_v15 }
 0xb3c   :  { %v2707_v14 = vpop.eup %2706 }
 0xb3d   :  { %759 = vrot.lane.b32.xlu0 %v2707_v14, %s2896_s9  ;;  %v2709_v16 = vpop.eup %2708 }
 0xb3e   :  { %v737_v17 = vadd.f32 1.0, %v2709_v16 }
 0xb40   :  { %2710 = vrcp.f32 %v737_v17 }
 0xb4a   :  { %v2711_v18 = vpop.eup %2710 }
 0xbaf   :  { %v760_v21 = vpop.permute.xlu0 %759 }
 0xbb0   :  { %v3181_v23 = vmul.f32 %v2711_v18, %v760_v21 }
 0xbb2   :  { %v775_v24 = vrot.slane %v3181_v23, 4 }
 0xbb4   :  { %2309 = vmatmul.mubr.msk.f32.vlgmr.msra.gmra.mrb[6].mxu0 %vm75_vm0, %v775_v24 }
 0xbb5   :  { %2472 = vmatpush1.bf16.msra.mxu0 %v2962_v13  ;;  %1096 = vmatprep.mubr.f32.mxu0 %v2895_v0 }
 0xbb6   :  { %2474 = vmatprep.subr.bf16.mxu0 %v2984_v22 }
 0xbb9   :  { %2476 = vmatpush1.bf16.msra.mxu0 %v2995_v26 }
 0xbba   :  { %2478 = vmatprep.subr.bf16.mxu0 %v3016_v35 }
 0xbbd   :  { %2480 = vmatpush1.bf16.msra.mxu0 %v3028_v39 }
 0xbbe   :  { %2482 = vmatprep.subr.bf16.mxu0 %v3040_v44 }
 0xbc1   :  { %2484 = vmatpush1.bf16.msra.mxu0 %v3049_v48 }
 0xc87   :  { %v844_v25 = vpop.f32.mrb[6].mxu0 }
 0xc88   :  { %v846_v27 = vpop.f32.mrb[7].mxu0  ;;  %v851_v22 = vrot.slane %v844_v25, 3 }
 0xc89   :  { %v852_v28 = vrot.slane %v846_v27, 3 }
 0xc8a   :  { %v855_v26 = vadd.f32 %v851_v22, %v3093_v1 }
 0xc8b   :  { %v856_v29 = vadd.f32 %v852_v28, %v3086_v58 }
 0xc8c   :  { %v2310_v30 = vmul.f32 -1.442695, %v855_v26 }
 0xc8d   :  { %2712 = vtanh.f32 %v856_v29  ;;  %v2311_v37 = vmul.f32 -1.442695, %v856_v29 }
 0xc8e   :  { %2714 = vpow2.f32 %v2310_v30 }
 0xc97   :  { %v2713_v13 = vpop.eup %2712 }
 0xc98   :  { %875 = vrot.lane.b32.xlu1 %v2713_v13, %s2896_s9  ;;  %v2715_v35 = vpop.eup %2714 }
 0xc99   :  { %v863_v39 = vadd.f32 1.0, %v2715_v35 }
 0xc9b   :  { %2716 = vrcp.f32 %v863_v39 }
 0xca5   :  { %v2717_v44 = vpop.eup %2716 }
 0xca6   :  { %v873_v33 = vmul.f32 %v2717_v44, %v871_v32  ;;  %v1157_v32 = vld [vmem:[#allocation3 + $0x8] sm:$0xff] }
 0xd0a   :  { %v876_v31 = vpop.permute.xlu1 %875 }
 0xd0b   :  { %v878_v48 = vmul.f32 %v2717_v44, %v876_v31 }
 0xd0d   :  { %880 = vrot.lane.b32.xlu0 %v878_v48, %s2896_s9 }
 0xd7f   :  { %v881_v34 = vpop.permute.xlu0 %880 }
 0xd80   :  { %v883_v36 = vadd.f32 %v881_v34, %v873_v33  ;;  %v1159_v33 = vld [vmem:[#allocation3 + $0x18] sm:$0xff]  ;;  %v1156_v34 = vld [vmem:[#allocation3] sm:$0xff] }
 0xd82   :  { %2718 = vtanh.f32 %v883_v36  ;;  %v998_v4 = vrot.slane %v883_v36, 7  ;;  %v2485_v36 = vpack.c.bf16 %v1159_v33, %v1157_v32  ;;  %v1199_v33 = vld [vmem:[#allocation3 + $0x158] sm:$0xff] }
 0xd83   :  { %2720 = vpow2.f32 %v2311_v37  ;;  %v1161_v37 = vld [vmem:[#allocation3 + $0x28] sm:$0xff] }
 0xd84   :  { %2486 = vmatprep.subr.bf16.mxu1 %v2485_v36  ;;  %v1198_v36 = vld [vmem:[#allocation3 + $0x150] sm:$0xff] }
 0xd8c   :  { %v2719_v9 = vpop.eup %2718 }
 0xd8d   :  { %886 = vrot.lane.b32.xlu1 %v2719_v9, %s2896_s9  ;;  %v2721_v38 = vpop.eup %2720  ;;  %v1158_v9 = vld [vmem:[#allocation3 + $0x10] sm:$0xff] }
 0xd8e   :  { %v864_v40 = vadd.f32 1.0, %v2721_v38  ;;  %v1163_v38 = vld [vmem:[#allocation3 + $0x38] sm:$0xff] }
 0xd90   :  { %2722 = vrcp.f32 %v864_v40  ;;  %v2487_v40 = vpack.c.bf16 %v1158_v9, %v1156_v34  ;;  %v1196_v34 = vld [vmem:[#allocation3 + $0x140] sm:$0xff] }
 0xd9a   :  { %v2723_v41 = vpop.eup %2722 }
 0xdff   :  { %v887_v42 = vpop.permute.xlu1 %886 }
 0xe00   :  { %v3198_v43 = vmul.f32 %v2723_v41, %v887_v42  ;;  %v2489_v41 = vpack.c.bf16 %v1163_v38, %v1161_v37  ;;  %v1160_v42 = vld [vmem:[#allocation3 + $0x20] sm:$0xff]  ;;  %v3255_v37 = vpack.c.bf16 %v1198_v36, %v1196_v34  ;;  %v1187_v38 = vld [vmem:[#allocation3 + $0xf8] sm:$0xff] }
 0xe02   :  { %v902_v45 = vrot.slane %v3198_v43, 5 }
 0xe04   :  { %2312 = vmatmul.mubr.msk.f32.vlgmr.msra.gmra.mrb[6].mxu1 %vm75_vm0, %v902_v45  ;;  %v1162_v45 = vld [vmem:[#allocation3 + $0x30] sm:$0xff] }
 0xe05   :  { %1282 = vmatprep.mubr.f32.mxu1 %v2895_v0  ;;  %2488 = vmatpush1.bf16.msra.mxu1 %v2487_v40 }
 0xe06   :  { %2490 = vmatprep.subr.bf16.mxu1 %v2489_v41  ;;  %v1184_v41 = vld [vmem:[#allocation3 + $0xe0] sm:$0xff] }
 0xed7   :  { %v971_v46 = vpop.f32.mrb[6].mxu1 }
 0xed8   :  { %v973_v47 = vpop.f32.mrb[7].mxu1  ;;  %v978_v56 = vrot.slane %v971_v46, 2  ;;  %v1165_v46 = vld [vmem:[#allocation3 + $0x48] sm:$0xff] }
 0xed9   :  { %v979_v49 = vrot.slane %v973_v47, 2  ;;  %v1167_v47 = vld [vmem:[#allocation3 + $0x58] sm:$0xff] }
 0xeda   :  { %v982_v57 = vadd.f32 %v978_v56, %v3093_v1  ;;  %v1166_v56 = vld [vmem:[#allocation3 + $0x50] sm:$0xff] }
 0xedb   :  { %v983_v54 = vadd.f32 %v979_v49, %v3086_v58  ;;  %v2491_v49 = vpack.c.bf16 %v1162_v45, %v1160_v42  ;;  %v1186_v42 = vld [vmem:[#allocation3 + $0xf0] sm:$0xff]  ;;  %v1201_v45 = vld [vmem:[#allocation3 + $0x168] sm:$0xff] }
 0xedc   :  { %v2313_v59 = vmul.f32 -1.442695, %v982_v57  ;;  %v1169_v57 = vld [vmem:[#allocation3 + $0x68] sm:$0xff] }
 0xedd   :  { %2724 = vtanh.f32 %v983_v54  ;;  %v2314_v10 = vmul.f32 -1.442695, %v983_v54  ;;  %v2493_v54 = vpack.c.bf16 %v1167_v47, %v1165_v46  ;;  %2492 = vmatpush1.bf16.msra.mxu1 %v2491_v49  ;;  %v2515_v46 = vpack.c.bf16 %v1186_v42, %v1184_v41  ;;  %v1203_v47 = vld [vmem:[#allocation3 + $0x178] sm:$0xff]  ;;  %v1200_v49 = vld [vmem:[#allocation3 + $0x160] sm:$0xff] }
 0xede   :  { %2726 = vpow2.f32 %v2313_v59  ;;  %v1171_v59 = vld [vmem:[#allocation3 + $0x78] sm:$0xff] }
 0xedf   :  { %2494 = vmatprep.subr.bf16.mxu1 %v2493_v54  ;;  %v1202_v54 = vld [vmem:[#allocation3 + $0x170] sm:$0xff] }
 0xee7   :  { %v2725_v55 = vpop.eup %2724 }
 0xee8   :  { %1002 = vrot.lane.b32.xlu0 %v2725_v55, %s2896_s9  ;;  %v2727_v60 = vpop.eup %2726  ;;  %v1164_v55 = vld [vmem:[#allocation3 + $0x40] sm:$0xff] }
 0xee9   :  { %v990_v61 = vadd.f32 1.0, %v2727_v60  ;;  %v1189_v60 = vld [vmem:[#allocation3 + $0x108] sm:$0xff] }
 0xeeb   :  { %2728 = vrcp.f32 %v990_v61  ;;  %v1191_v61 = vld [vmem:[#allocation3 + $0x118] sm:$0xff] }
 0xef5   :  { %v2729_v63 = vpop.eup %2728 }
 0xef6   :  { %v1000_v5 = vmul.f32 %v2729_v63, %v998_v4  ;;  %v1168_v4 = vld [vmem:[#allocation3 + $0x60] sm:$0xff] }
 0xf5a   :  { %v1003_v2 = vpop.permute.xlu0 %1002 }
 0xf5b   :  { %v1005_v3 = vmul.f32 %v2729_v63, %v1003_v2  ;;  %v1188_v63 = vld [vmem:[#allocation3 + $0x100] sm:$0xff]  ;;  %v1190_v2 = vld [vmem:[#allocation3 + $0x110] sm:$0xff] }
 0xf5d   :  { %1007 = vrot.lane.b32.xlu1 %v1005_v3, %s2896_s9  ;;  %v2495_v3 = vpack.c.bf16 %v1166_v56, %v1164_v55  ;;  %v3259_v55 = vpack.c.bf16 %v1203_v47, %v1201_v45  ;;  %v3261_v56 = vpack.c.bf16 %v1202_v54, %v1200_v49 }
 0xf5f   :  { %2496 = vmatpush1.bf16.msra.mxu1 %v2495_v3 }
 0xfcf   :  { %v1008_v6 = vpop.permute.xlu1 %1007 }
 0xfd0   :  { %v1010_v7 = vadd.f32 %v1008_v6, %v1000_v5  ;;  %v1170_v5 = vld [vmem:[#allocation3 + $0x70] sm:$0xff]  ;;  %v3236_v6 = vpack.c.bf16 %v1191_v61, %v1189_v60 }
 0xfd2   :  { %2730 = vtanh.f32 %v1010_v7  ;;  %2518 = vmatprep.subr.bf16.mxu0 %v3236_v6 }
 0xfd3   :  { %2732 = vpow2.f32 %v2314_v10  ;;  %v1193_v10 = vld [vmem:[#allocation3 + $0x128] sm:$0xff] }
 0xfdc   :  { %v2731_v8 = vpop.eup %2730 }
 0xfdd   :  { %1013 = vrot.lane.b32.xlu0 %v2731_v8, %s2896_s9  ;;  %v2733_v11 = vpop.eup %2732  ;;  %v1173_v8 = vld [vmem:[#allocation3 + $0x88] sm:$0xff] }
 0xfde   :  { %v991_v12 = vadd.f32 1.0, %v2733_v11  ;;  %v1195_v11 = vld [vmem:[#allocation3 + $0x138] sm:$0xff] }
 0xfe0   :  { %2734 = vrcp.f32 %v991_v12  ;;  %v1175_v12 = vld [vmem:[#allocation3 + $0x98] sm:$0xff] }
 0xfea   :  { %v2735_v14 = vpop.eup %2734 }
0x104f   :  { %v1014_v15 = vpop.permute.xlu0 %1013 }
0x1050   :  { %v3208_v16 = vmul.f32 %v2735_v14, %v1014_v15  ;;  %v3243_v14 = vpack.c.bf16 %v1195_v11, %v1193_v10  ;;  %v1192_v15 = vld [vmem:[#allocation3 + $0x120] sm:$0xff] }
0x1052   :  { %v1029_v17 = vrot.slane %v3208_v16, 6 }
0x1054   :  { %2315 = vmatmul.mubr.msk.f32.vlgmr.msra.gmra.mrb[8].mxu0 %vm75_vm0, %v1029_v17  ;;  %v1194_v17 = vld [vmem:[#allocation3 + $0x130] sm:$0xff] }
0x1055   :  { %1353 = vmatprep.mubr.f32.mxu0 %v2895_v0 }
0x1127   :  { %v1098_v18 = vpop.f32.mrb[8].mxu0 }
0x1128   :  { %v1100_v21 = vpop.f32.mrb[9].mxu0  ;;  %v1105_v28 = vrot.slane %v1098_v18, 1  ;;  %v3246_v18 = vpack.c.bf16 %v1194_v17, %v1192_v15 }
0x1129   :  { %v1106_v24 = vrot.slane %v1100_v21, 1  ;;  %v2499_v21 = vpack.c.bf16 %v1170_v5, %v1168_v4 }
0x112a   :  { %v1109_v29 = vadd.f32 %v1105_v28, %v3093_v1  ;;  %v1177_v28 = vld [vmem:[#allocation3 + $0xa8] sm:$0xff] }
0x112b   :  { %v3214_v25 = vadd.f32 %v1106_v24, %v3086_v58  ;;  %v1125_v58 = vrot.slane %v1010_v7, 7  ;;  %v3238_v7 = vpack.c.bf16 %v1190_v2, %v1188_v63  ;;  %v1172_v24 = vld [vmem:[#allocation3 + $0x80] sm:$0xff] }
0x112c   :  { %v2316_v13 = vmul.f32 -1.442695, %v1109_v29  ;;  %v1179_v29 = vld [vmem:[#allocation3 + $0xb8] sm:$0xff] }
0x112d   :  { %2736 = vtanh.f32 %v3214_v25  ;;  %2520 = vmatpush1.bf16.msra.mxu0 %v3238_v7 }
0x112e   :  { %2738 = vpow2.f32 %v2316_v13  ;;  %2522 = vmatprep.subr.bf16.mxu0 %v3243_v14 }
0x1131   :  { %2524 = vmatpush1.bf16.msra.mxu0 %v3246_v18 }
0x1137   :  { %v2737_v27 = vpop.eup %2736 }
0x1138   :  { %1129 = vrot.lane.b32.xlu1 %v2737_v27, %s2896_s9  ;;  %v2739_v22 = vpop.eup %2738  ;;  %v1174_v27 = vld [vmem:[#allocation3 + $0x90] sm:$0xff] }
0x1139   :  { %v1117_v26 = vadd.f32 1.0, %v2739_v22  ;;  %v2503_v13 = vpack.c.bf16 %v1174_v27, %v1172_v24  ;;  %v2505_v22 = vpack.c.bf16 %v1179_v29, %v1177_v28 }
0x113b   :  { %2740 = vrcp.f32 %v1117_v26  ;;  %v1176_v26 = vld [vmem:[#allocation3 + $0xa0] sm:$0xff] }
0x1145   :  { %v2741_v30 = vpop.eup %2740 }
0x1146   :  { %v1127_v1 = vmul.f32 %v2741_v30, %v1125_v58 }
0x11aa   :  { %v1130_v35 = vpop.permute.xlu1 %1129 }
0x11ab   :  { %v1132_v39 = vmul.f32 %v2741_v30, %v1130_v35  ;;  %v1178_v30 = vld [vmem:[#allocation3 + $0xb0] sm:$0xff] }
0x11ac   :  { %v2507_v35 = vpack.c.bf16 %v1178_v30, %v1176_v26 }
0x11ad   :  { %1134 = vrot.lane.b32.xlu0 %v1132_v39, %s2896_s9 }
0x11b1   :  { %261 = vrot.lane.b32.xlu0 %v3098_v20, %s2896_s9 }
0x11b5   :  { %514 = vrot.lane.b32.xlu0 %v3140_v19, %s2896_s9 }
0x11b9   :  { %768 = vrot.lane.b32.xlu0 %v3181_v23, %s2896_s9 }
0x11bd   :  { %1022 = vrot.lane.b32.xlu0 %v3208_v16, %s2896_s9 }
0x121f   :  { %v1135_v44 = vpop.permute.xlu0 %1134 }
0x1220   :  { %v1137_v31 = vadd.f32 %v1135_v44, %v1127_v1  ;;  %v1181_v1 = vld [vmem:[#allocation3 + $0xc8] sm:$0xff]  ;;  %v1183_v44 = vld [vmem:[#allocation3 + $0xd8] sm:$0xff] }
0x1222   :  { %2742 = vtanh.f32 %v1137_v31  ;;  %v2509_v31 = vpack.c.bf16 %v1183_v44, %v1181_v1 }
0x1223   :  { %v262_v48 = vpop.permute.xlu0 %261 }
0x1224   :  { %265 = vst.msk [vmem:[#allocation2 + $0x7] sm:$0x1] %vm264_vm9, %v262_v48  ;;  %vm3486_vm9 = vcmask 522502  }
0x1225   :  { %267 = vst.msk [vmem:[#allocation2] sm:$0x1] %vm3485_vm10, %v262_v48  ;;  %v1180_v48 = vld [vmem:[#allocation3 + $0xc0] sm:$0xff]  ;;  %vm773_vm10 = vcmask 1045252  }
0x1227   :  { %v515_v20 = vpop.permute.xlu0 %514 }
0x1228   :  { %518 = vst.msk [vmem:[#allocation2 + $0x3] sm:$0x4] %vm517_vm11, %v515_v20  ;;  %vm1025_vm11 = vcmask 784902  }
0x1229   :  { %520 = vst.msk [vmem:[#allocation2] sm:$0x4] %vm3483_vm12, %v515_v20  ;;  %v1182_v20 = vld [vmem:[#allocation3 + $0xd0] sm:$0xff]  ;;  %vm646_vm12 = vcmask 1044227  }
0x122a   :  { %891 = vst.msk [vmem:[#allocation2] sm:$0x20] %vm890_vm13, %v3198_v43  ;;  %v2511_v32 = vpack.c.bf16 %v1182_v20, %v1180_v48  ;;  %vm1027_vm13 = vcmask 1047302  }
0x122b   :  { %893 = vst.msk [vmem:[#allocation2 - $0x3] sm:$0x20] %vm3482_vm14, %v3198_v43  ;;  %vm644_vm14 = vcmask 781827  }
0x122c   :  { %v2743_v19 = vpop.eup %2742 }
0x122d   :  { %1140 = vrot.lane.b32.xlu1 %v2743_v19, %s2896_s9  ;;  %v1197_v19 = vld [vmem:[#allocation3 + $0x148] sm:$0xff] }
0x122e   :  { %v3253_v9 = vpack.c.bf16 %v1199_v33, %v1197_v19 }
0x1230   :  { %2526 = vmatprep.subr.bf16.mxu0 %v3253_v9 }
0x1231   :  { %387 = vrot.lane.b32.xlu1 %v3119_v50, %s2896_s9  ;;  %v2497_v50 = vpack.c.bf16 %v1171_v59, %v1169_v57  ;;  %2528 = vmatpush1.bf16.msra.mxu0 %v3255_v37  ;;  %v769_v59 = vpop.permute.xlu0 %768 }
0x1232   :  { %2530 = vmatprep.subr.bf16.mxu0 %v3259_v55 }
0x1233   :  { %2498 = vmatprep.subr.bf16.mxu1 %v2497_v50 }
0x1234   :  { %2500 = vmatpush1.bf16.msra.mxu1 %v2499_v21 }
0x1235   :  { %641 = vrot.lane.b32.xlu1 %v3161_v53, %s2896_s9  ;;  %v2501_v53 = vpack.c.bf16 %v1175_v12, %v1173_v8  ;;  %2532 = vmatpush1.bf16.msra.mxu0 %v3261_v56  ;;  %v1023_v2 = vpop.permute.xlu0 %1022  ;;  %v1205_v8 = vld [vmem:[#allocation3 + $0x180] ss:$8 sm:$0x3] }
0x1236   :  { %2534 = vmatprep.subr.bf16.mxu0 %v3236_v6  ;;  %v1215_v10 = vrot.slane %v1205_v8, %v71_v52 }
0x1237   :  { %2502 = vmatprep.subr.bf16.mxu1 %v2501_v53  ;;  %v1211_v53 = vrot.slane %v1205_v8, %v67_v62 }
0x1238   :  { %2504 = vmatpush1.bf16.msra.mxu1 %v2503_v13  ;;  %1354 = vmatmul.mubr.f32.vlgmr.msra.gmra.mrb[10].mxu0 %v2895_v0 }
0x1239   :  { %895 = vrot.lane.b32.xlu1 %v3198_v43, %s2896_s9  ;;  %2506 = vmatprep.subr.bf16.mxu1 %v2505_v22  ;;  %v2317_v43 = vmul.f32 -1.442695, %v3214_v25  ;;  %v1185_v25 = vld [vmem:[#allocation3 + $0xe8] sm:$0xff] }
0x123a   :  { %v2513_v40 = vpack.c.bf16 %v1187_v38, %v1185_v25  ;;  %2536 = vmatpush1.bf16.msra.mxu0 %v3238_v7  ;;  %1467 = vmatprep.mubr.f32.mxu0 %v2895_v0 }
0x123b   :  { %2744 = vpow2.f32 %v2317_v43  ;;  %2538 = vmatprep.subr.bf16.mxu0 %v3243_v14 }
0x123c   :  { %2508 = vmatpush1.bf16.msra.mxu1 %v2507_v35 }
0x123d   :  { %2510 = vmatprep.subr.bf16.mxu1 %v2509_v31 }
0x123e   :  { %2540 = vmatpush1.bf16.msra.mxu0 %v3246_v18 }
0x123f   :  { %2542 = vmatprep.subr.bf16.mxu0 %v3253_v9 }
0x1240   :  { %2512 = vmatpush1.bf16.msra.mxu1 %v2511_v32 }
0x1241   :  { %2514 = vmatprep.subr.bf16.mxu1 %v2513_v40 }
0x1242   :  { %2544 = vmatpush1.bf16.msra.mxu0 %v3255_v37 }
0x1243   :  { %2546 = vmatprep.subr.bf16.mxu0 %v3259_v55 }
0x1244   :  { %2516 = vmatpush1.bf16.msra.mxu1 %v2515_v46 }
0x1245   :  { %v2745_v39 = vpop.eup %2744  ;;  %2550 = vmatprep.subr.bf16.mxu1 %v3236_v6 }
0x1246   :  { %v1118_v58 = vadd.f32 1.0, %v2745_v39  ;;  %2548 = vmatpush1.bf16.msra.mxu0 %v3261_v56 }
0x1247   :  { %2566 = vmatprep.subr.bf16.mxu0 %v3236_v6 }
0x1248   :  { %2746 = vrcp.f32 %v1118_v58 }
0x1252   :  { %v2747_v57 = vpop.eup %2746 }
0x129f   :  { %v1141_v60 = vpop.permute.xlu1 %1140 }
0x12a0   :  { %v1143_v61 = vmul.f32 %v2747_v57, %v1141_v60 }
0x12a2   :  { %1149 = vrot.lane.b32.xlu1 %v1143_v61, %s2896_s9  ;;  %1145 = vst.msk [vmem:[#allocation2] sm:$0x80] %vm1144_vm15, %v1143_v61  ;;  %vm763_vm15 = vcmask 258052  }
0x12a3   :  { %1147 = vst.msk [vmem:[#allocation2 - $0x7] sm:$0x80] %vm3484_vm1, %v1143_v61  ;;  %v388_v63 = vpop.permute.xlu1 %387  ;;  %vm765_vm1 = vcmask 520452  }
0x12a4   :  { %391 = vst.msk [vmem:[#allocation2 + $0x5] sm:$0x2] %vm390_vm3, %v388_v63  ;;  %vm771_vm3 = vcmask 782852  }
0x12a5   :  { %393 = vst.msk [vmem:[#allocation2] sm:$0x2] %vm392_vm5, %v388_v63 }
0x12a6   :  { %1018 = vst.msk [vmem:[#allocation2] sm:$0x40] %vm1017_vm7, %v3208_v16  ;;  %vm898_vm7 = vcmask 783877  }
0x12a7   :  { %1020 = vst.msk [vmem:[#allocation2 - $0x5] sm:$0x40] %vm3486_vm9, %v3208_v16  ;;  %v642_v3 = vpop.permute.xlu1 %641  ;;  %vm900_vm9 = vcmask 1046277  }
0x12a8   :  { %1026 = vst.msk [vmem:[#allocation2 - $0x5] sm:$0x40] %vm1025_vm11, %v1023_v2  ;;  %vm1154_vm11 = vcmask 1048327  }
0x12a9   :  { %1028 = vst.msk [vmem:[#allocation2] sm:$0x40] %vm1027_vm13, %v1023_v2 }
0x12aa   :  { %645 = vst.msk [vmem:[#allocation2 + $0x1] sm:$0x8] %vm644_vm14, %v642_v3  ;;  %vm1152_vm14 = vcmask 785927  }
0x12ab   :  { %647 = vst.msk [vmem:[#allocation2] sm:$0x8] %vm646_vm12, %v642_v3  ;;  %v896_v16 = vpop.permute.xlu1 %895 }
0x12ac   :  { %764 = vst.msk [vmem:[#allocation2] sm:$0x10] %vm763_vm15, %v3181_v23 }
0x12ad   :  { %766 = vst.msk [vmem:[#allocation2 - $0x1] sm:$0x10] %vm765_vm1, %v3181_v23 }
0x12ae   :  { %772 = vst.msk [vmem:[#allocation2 - $0x1] sm:$0x10] %vm771_vm3, %v769_v59 }
0x12af   :  { %774 = vst.msk [vmem:[#allocation2] sm:$0x10] %vm773_vm10, %v769_v59 }
0x12b0   :  { %899 = vst.msk [vmem:[#allocation2 - $0x3] sm:$0x20] %vm898_vm7, %v896_v16 }
0x12b1   :  { %901 = vst.msk [vmem:[#allocation2] sm:$0x20] %vm900_vm9, %v896_v16 }
0x130b   :  { %v1355_v5 = vpop.f32.mrb[10].mxu0 }
0x130c   :  { %v1357_v50 = vpop.f32.mrb[11].mxu0 }
0x1314   :  { %v1150_v4 = vpop.permute.xlu1 %1149 }
0x1315   :  { %1153 = vst.msk [vmem:[#allocation2 - $0x7] sm:$0x80] %vm1152_vm14, %v1150_v4 }
0x1316   :  { %1155 = vst.msk [vmem:[#allocation2] sm:$0x80] %vm1154_vm11, %v1150_v4 }
0x131d   :  { %v3291_v23 = vld [vmem:[#allocation2] sm:$0xff] }
0x131e   :  { %1283 = vmatmul.mubr.f32.vlgmr.msra.gmra.mrb[8].mxu1 %v3291_v23 }
0x131f   :  { %2552 = vmatpush1.bf16.msra.mxu1 %v3238_v7  ;;  %1591 = vmatprep.mubr.f32.mxu1 %v2895_v0 }
0x1320   :  { %2554 = vmatprep.subr.bf16.mxu1 %v3243_v14 }
0x1323   :  { %2556 = vmatpush1.bf16.msra.mxu1 %v3246_v18 }
0x1324   :  { %2558 = vmatprep.subr.bf16.mxu1 %v3253_v9 }
0x1327   :  { %2560 = vmatpush1.bf16.msra.mxu1 %v3255_v37 }
0x1328   :  { %2562 = vmatprep.subr.bf16.mxu1 %v3259_v55 }
0x132b   :  { %2564 = vmatpush1.bf16.msra.mxu1 %v3261_v56 }
0x132c   :  { %2582 = vmatprep.subr.bf16.mxu1 %v3236_v6 }
0x13f1   :  { %v1284_v11 = vpop.f32.mrb[8].mxu1 }
0x13f2   :  { %v1286_v12 = vpop.f32.mrb[9].mxu1  ;;  %v3311_v24 = vadd.f32 %v1284_v11, %v1211_v53 }
0x13f3   :  { %v3305_v15 = vadd.f32 %v1286_v12, %v1215_v10 }
0x13f4   :  { %v1360_v27 = vadd.f32 %v1355_v5, %v3311_v24 }
0x13f5   :  { %v1361_v17 = vadd.f32 %v1357_v50, %v3305_v15 }
0x13f6   :  { %v2318_v28 = vmul.f32 -1.442695, %v1360_v27 }
0x13f7   :  { %2748 = vtanh.f32 %v1361_v17  ;;  %v2319_v62 = vmul.f32 -1.442695, %v1361_v17 }
0x13f8   :  { %2750 = vpow2.f32 %v2318_v28 }
0x1401   :  { %v2749_v21 = vpop.eup %2748 }
0x1402   :  { %1377 = vrot.lane.b32.xlu0 %v2749_v21, %s2896_s9  ;;  %v2751_v52 = vpop.eup %2750 }
0x1403   :  { %v1368_v29 = vadd.f32 1.0, %v2751_v52 }
0x1405   :  { %2752 = vrcp.f32 %v1368_v29 }
0x140f   :  { %v2753_v13 = vpop.eup %2752 }
0x1410   :  { %v1375_v30 = vmul.f32 0.0, %v2753_v13 }
0x1474   :  { %v1378_v22 = vpop.permute.xlu0 %1377 }
0x1475   :  { %v1380_v26 = vmul.f32 %v2753_v13, %v1378_v22 }
0x1477   :  { %1382 = vrot.lane.b32.xlu1 %v1380_v26, %s2896_s9 }
0x14e9   :  { %v1383_v35 = vpop.permute.xlu1 %1382 }
0x14ea   :  { %v1385_v43 = vadd.f32 %v1383_v35, %v1375_v30 }
0x14ec   :  { %2754 = vtanh.f32 %v1385_v43  ;;  %v1496_v46 = vrot.slane %v1385_v43, 7 }
0x14ed   :  { %2756 = vpow2.f32 %v2319_v62 }
0x14f6   :  { %v2755_v51 = vpop.eup %2754 }
0x14f7   :  { %1388 = vrot.lane.b32.xlu0 %v2755_v51, %s2896_s9  ;;  %v2757_v39 = vpop.eup %2756 }
0x14f8   :  { %v1369_v58 = vadd.f32 1.0, %v2757_v39 }
0x14fa   :  { %2758 = vrcp.f32 %v1369_v58 }
0x1504   :  { %v2759_v1 = vpop.eup %2758 }
0x1569   :  { %v1389_v44 = vpop.permute.xlu0 %1388 }
0x156a   :  { %v3316_v31 = vmul.f32 %v2759_v1, %v1389_v44 }
0x156c   :  { %2320 = vmatmul.mubr.msk.f32.vlgmr.msra.gmra.mrb[12].mxu0 %vm75_vm0, %v3316_v31 }
0x156d   :  { %2568 = vmatpush1.bf16.msra.mxu0 %v3238_v7  ;;  %1715 = vmatprep.mubr.f32.mxu0 %v2895_v0 }
0x156e   :  { %2570 = vmatprep.subr.bf16.mxu0 %v3243_v14 }
0x1571   :  { %2572 = vmatpush1.bf16.msra.mxu0 %v3246_v18 }
0x1572   :  { %2574 = vmatprep.subr.bf16.mxu0 %v3253_v9 }
0x1575   :  { %2576 = vmatpush1.bf16.msra.mxu0 %v3255_v37 }
0x1576   :  { %2578 = vmatprep.subr.bf16.mxu0 %v3259_v55 }
0x1579   :  { %2580 = vmatpush1.bf16.msra.mxu0 %v3261_v56 }
0x157a   :  { %2598 = vmatprep.subr.bf16.mxu0 %v3236_v6 }
0x163f   :  { %v1469_v48 = vpop.f32.mrb[12].mxu0 }
0x1640   :  { %v1471_v20 = vpop.f32.mrb[13].mxu0  ;;  %v1476_v34 = vrot.slane %v1469_v48, 7 }
0x1641   :  { %v1477_v19 = vrot.slane %v1471_v20, 7 }
0x1642   :  { %v1480_v36 = vadd.f32 %v1476_v34, %v3311_v24 }
0x1643   :  { %v1481_v32 = vadd.f32 %v1477_v19, %v3305_v15 }
0x1644   :  { %v2321_v25 = vmul.f32 -1.442695, %v1480_v36 }
0x1645   :  { %2760 = vtanh.f32 %v1481_v32  ;;  %v2322_v59 = vmul.f32 -1.442695, %v1481_v32 }
0x1646   :  { %2762 = vpow2.f32 %v2321_v25 }
0x164f   :  { %v2761_v33 = vpop.eup %2760 }
0x1650   :  { %1500 = vrot.lane.b32.xlu1 %v2761_v33, %s2896_s9  ;;  %v2763_v38 = vpop.eup %2762 }
0x1651   :  { %v1488_v40 = vadd.f32 1.0, %v2763_v38 }
0x1653   :  { %2764 = vrcp.f32 %v1488_v40 }
0x165d   :  { %v2765_v41 = vpop.eup %2764 }
0x165e   :  { %v1498_v47 = vmul.f32 %v2765_v41, %v1496_v46 }
0x16c2   :  { %v1501_v42 = vpop.permute.xlu1 %1500 }
0x16c3   :  { %v1503_v45 = vmul.f32 %v2765_v41, %v1501_v42 }
0x16c5   :  { %1505 = vrot.lane.b32.xlu0 %v1503_v45, %s2896_s9 }
0x1737   :  { %v1506_v49 = vpop.permute.xlu0 %1505 }
0x1738   :  { %v1508_v54 = vadd.f32 %v1506_v49, %v1498_v47 }
0x173a   :  { %2766 = vtanh.f32 %v1508_v54  ;;  %v1620_v29 = vrot.slane %v1508_v54, 7 }
0x173b   :  { %2768 = vpow2.f32 %v2322_v59 }
0x1744   :  { %v2767_v57 = vpop.eup %2766 }
0x1745   :  { %1511 = vrot.lane.b32.xlu1 %v2767_v57, %s2896_s9  ;;  %v2769_v60 = vpop.eup %2768 }
0x1746   :  { %v1489_v61 = vadd.f32 1.0, %v2769_v60 }
0x1748   :  { %2770 = vrcp.f32 %v1489_v61 }
0x1752   :  { %v2771_v63 = vpop.eup %2770 }
0x17b7   :  { %v1512_v2 = vpop.permute.xlu1 %1511 }
0x17b8   :  { %v3334_v3 = vmul.f32 %v2771_v63, %v1512_v2 }
0x17ba   :  { %v1524_v16 = vrot.slane %v3334_v3, 1 }
0x17bc   :  { %2323 = vmatmul.mubr.msk.f32.vlgmr.msra.gmra.mrb[10].mxu1 %vm75_vm0, %v1524_v16 }
0x17bd   :  { %2584 = vmatpush1.bf16.msra.mxu1 %v3238_v7  ;;  %1839 = vmatprep.mubr.f32.mxu1 %v2895_v0 }
0x17be   :  { %2586 = vmatprep.subr.bf16.mxu1 %v3243_v14 }
0x17c1   :  { %2588 = vmatpush1.bf16.msra.mxu1 %v3246_v18 }
0x17c2   :  { %2590 = vmatprep.subr.bf16.mxu1 %v3253_v9 }
0x17c5   :  { %2592 = vmatpush1.bf16.msra.mxu1 %v3255_v37 }
0x17c6   :  { %2594 = vmatprep.subr.bf16.mxu1 %v3259_v55 }
0x17c9   :  { %2596 = vmatpush1.bf16.msra.mxu1 %v3261_v56 }
0x17ca   :  { %2614 = vmatprep.subr.bf16.mxu1 %v3236_v6 }
0x188f   :  { %v1593_v4 = vpop.f32.mrb[10].mxu1 }
0x1890   :  { %v1595_v5 = vpop.f32.mrb[11].mxu1  ;;  %v1600_v11 = vrot.slane %v1593_v4, 6 }
0x1891   :  { %v1601_v50 = vrot.slane %v1595_v5, 6 }
0x1892   :  { %v1604_v12 = vadd.f32 %v1600_v11, %v3311_v24 }
0x1893   :  { %v1605_v8 = vadd.f32 %v1601_v50, %v3305_v15 }
0x1894   :  { %v2324_v17 = vmul.f32 -1.442695, %v1604_v12 }
0x1895   :  { %2772 = vtanh.f32 %v1605_v8  ;;  %v2325_v35 = vmul.f32 -1.442695, %v1605_v8 }
0x1896   :  { %2774 = vpow2.f32 %v2324_v17 }
0x189f   :  { %v2773_v10 = vpop.eup %2772 }
0x18a0   :  { %1624 = vrot.lane.b32.xlu0 %v2773_v10, %s2896_s9  ;;  %v2775_v21 = vpop.eup %2774 }
0x18a1   :  { %v1612_v53 = vadd.f32 1.0, %v2775_v21 }
0x18a3   :  { %2776 = vrcp.f32 %v1612_v53 }
0x18ad   :  { %v2777_v27 = vpop.eup %2776 }
0x18ae   :  { %v1622_v13 = vmul.f32 %v2777_v27, %v1620_v29 }
0x1912   :  { %v1625_v28 = vpop.permute.xlu0 %1624 }
0x1913   :  { %v1627_v52 = vmul.f32 %v2777_v27, %v1625_v28 }
0x1915   :  { %1629 = vrot.lane.b32.xlu1 %v1627_v52, %s2896_s9 }
0x1987   :  { %v1630_v22 = vpop.permute.xlu1 %1629 }
0x1988   :  { %v1632_v26 = vadd.f32 %v1630_v22, %v1622_v13 }
0x198a   :  { %2778 = vtanh.f32 %v1632_v26  ;;  %v1744_v42 = vrot.slane %v1632_v26, 7 }
0x198b   :  { %2780 = vpow2.f32 %v2325_v35 }
0x1994   :  { %v2779_v30 = vpop.eup %2778 }
0x1995   :  { %1635 = vrot.lane.b32.xlu0 %v2779_v30, %s2896_s9  ;;  %v2781_v43 = vpop.eup %2780 }
0x1996   :  { %v1613_v51 = vadd.f32 1.0, %v2781_v43 }
0x1998   :  { %2782 = vrcp.f32 %v1613_v51 }
0x19a2   :  { %v2783_v62 = vpop.eup %2782 }
0x1a07   :  { %v1636_v39 = vpop.permute.xlu0 %1635 }
0x1a08   :  { %v3352_v58 = vmul.f32 %v2783_v62, %v1636_v39 }
0x1a0a   :  { %v1648_v1 = vrot.slane %v3352_v58, 2 }
0x1a0c   :  { %2326 = vmatmul.mubr.msk.f32.vlgmr.msra.gmra.mrb[14].mxu0 %vm75_vm0, %v1648_v1 }
0x1a0d   :  { %2600 = vmatpush1.bf16.msra.mxu0 %v3238_v7  ;;  %1963 = vmatprep.mubr.f32.mxu0 %v2895_v0 }
0x1a0e   :  { %2602 = vmatprep.subr.bf16.mxu0 %v3243_v14 }
0x1a11   :  { %2604 = vmatpush1.bf16.msra.mxu0 %v3246_v18 }
0x1a12   :  { %2606 = vmatprep.subr.bf16.mxu0 %v3253_v9 }
0x1a15   :  { %2608 = vmatpush1.bf16.msra.mxu0 %v3255_v37 }
0x1a16   :  { %2610 = vmatprep.subr.bf16.mxu0 %v3259_v55 }
0x1a19   :  { %2612 = vmatpush1.bf16.msra.mxu0 %v3261_v56 }
0x1a1a   :  { %2630 = vmatprep.subr.bf16.mxu0 %v3236_v6 }
0x1adf   :  { %v1717_v44 = vpop.f32.mrb[14].mxu0 }
0x1ae0   :  { %v1719_v48 = vpop.f32.mrb[15].mxu0  ;;  %v1724_v33 = vrot.slane %v1717_v44, 5 }
0x1ae1   :  { %v1725_v20 = vrot.slane %v1719_v48, 5 }
0x1ae2   :  { %v1728_v34 = vadd.f32 %v1724_v33, %v3311_v24 }
0x1ae3   :  { %v1729_v19 = vadd.f32 %v1725_v20, %v3305_v15 }
0x1ae4   :  { %v2327_v36 = vmul.f32 -1.442695, %v1728_v34 }
0x1ae5   :  { %2784 = vtanh.f32 %v1729_v19  ;;  %v2328_v54 = vmul.f32 -1.442695, %v1729_v19 }
0x1ae6   :  { %2786 = vpow2.f32 %v2327_v36 }
0x1aef   :  { %v2785_v32 = vpop.eup %2784 }
0x1af0   :  { %1748 = vrot.lane.b32.xlu1 %v2785_v32, %s2896_s9  ;;  %v2787_v25 = vpop.eup %2786 }
0x1af1   :  { %v1736_v38 = vadd.f32 1.0, %v2787_v25 }
0x1af3   :  { %2788 = vrcp.f32 %v1736_v38 }
0x1afd   :  { %v2789_v40 = vpop.eup %2788 }
0x1afe   :  { %v1746_v45 = vmul.f32 %v2789_v40, %v1744_v42 }
0x1b62   :  { %v1749_v41 = vpop.permute.xlu1 %1748 }
0x1b63   :  { %v1751_v6 = vmul.f32 %v2789_v40, %v1749_v41 }
0x1b65   :  { %1753 = vrot.lane.b32.xlu0 %v1751_v6, %s2896_s9 }
0x1bd7   :  { %v1754_v46 = vpop.permute.xlu0 %1753 }
0x1bd8   :  { %v1756_v47 = vadd.f32 %v1754_v46, %v1746_v45 }
0x1bda   :  { %2790 = vtanh.f32 %v1756_v47  ;;  %v1868_v52 = vrot.slane %v1756_v47, 7 }
0x1bdb   :  { %2792 = vpow2.f32 %v2328_v54 }
0x1be4   :  { %v2791_v49 = vpop.eup %2790 }
0x1be5   :  { %1759 = vrot.lane.b32.xlu1 %v2791_v49, %s2896_s9  ;;  %v2793_v57 = vpop.eup %2792 }
0x1be6   :  { %v1737_v59 = vadd.f32 1.0, %v2793_v57 }
0x1be8   :  { %2794 = vrcp.f32 %v1737_v59 }
0x1bf2   :  { %v2795_v60 = vpop.eup %2794 }
0x1c57   :  { %v1760_v61 = vpop.permute.xlu1 %1759 }
0x1c58   :  { %v3370_v63 = vmul.f32 %v2795_v60, %v1760_v61 }
0x1c5a   :  { %v1772_v2 = vrot.slane %v3370_v63, 3 }
0x1c5c   :  { %2329 = vmatmul.mubr.msk.f32.vlgmr.msra.gmra.mrb[12].mxu1 %vm75_vm0, %v1772_v2 }
0x1c5d   :  { %2616 = vmatpush1.bf16.msra.mxu1 %v3238_v7  ;;  %2087 = vmatprep.mubr.f32.mxu1 %v2895_v0 }
0x1c5e   :  { %2618 = vmatprep.subr.bf16.mxu1 %v3243_v14 }
0x1c61   :  { %2620 = vmatpush1.bf16.msra.mxu1 %v3246_v18 }
0x1c62   :  { %2622 = vmatprep.subr.bf16.mxu1 %v3253_v9 }
0x1c65   :  { %2624 = vmatpush1.bf16.msra.mxu1 %v3255_v37 }
0x1c66   :  { %2626 = vmatprep.subr.bf16.mxu1 %v3259_v55 }
0x1c69   :  { %2628 = vmatpush1.bf16.msra.mxu1 %v3261_v56 }
0x1d2f   :  { %v1841_v16 = vpop.f32.mrb[12].mxu1 }
0x1d30   :  { %v1843_v4 = vpop.f32.mrb[13].mxu1  ;;  %v1848_v10 = vrot.slane %v1841_v16, 4 }
0x1d31   :  { %v1849_v5 = vrot.slane %v1843_v4, 4 }
0x1d32   :  { %v1852_v11 = vadd.f32 %v1848_v10, %v3311_v24 }
0x1d33   :  { %v1853_v50 = vadd.f32 %v1849_v5, %v3305_v15 }
0x1d34   :  { %v2330_v12 = vmul.f32 -1.442695, %v1852_v11 }
0x1d35   :  { %2796 = vtanh.f32 %v1853_v50  ;;  %v2331_v30 = vmul.f32 -1.442695, %v1853_v50 }
0x1d36   :  { %2798 = vpow2.f32 %v2330_v12 }
0x1d3f   :  { %v2797_v8 = vpop.eup %2796 }
0x1d40   :  { %1872 = vrot.lane.b32.xlu0 %v2797_v8, %s2896_s9  ;;  %v2799_v17 = vpop.eup %2798 }
0x1d41   :  { %v1860_v21 = vadd.f32 1.0, %v2799_v17 }
0x1d43   :  { %2800 = vrcp.f32 %v1860_v21 }
0x1d4d   :  { %v2801_v53 = vpop.eup %2800 }
0x1d4e   :  { %v1870_v29 = vmul.f32 %v2801_v53, %v1868_v52 }
0x1db2   :  { %v1873_v27 = vpop.permute.xlu0 %1872 }
0x1db3   :  { %v1875_v28 = vmul.f32 %v2801_v53, %v1873_v27 }
0x1db5   :  { %1877 = vrot.lane.b32.xlu1 %v1875_v28, %s2896_s9 }
0x1e27   :  { %v1878_v13 = vpop.permute.xlu1 %1877 }
0x1e28   :  { %v1880_v22 = vadd.f32 %v1878_v13, %v1870_v29 }
0x1e2a   :  { %2802 = vtanh.f32 %v1880_v22  ;;  %v1992_v33 = vrot.slane %v1880_v22, 7 }
0x1e2b   :  { %2804 = vpow2.f32 %v2331_v30 }
0x1e34   :  { %v2803_v26 = vpop.eup %2802 }
0x1e35   :  { %1883 = vrot.lane.b32.xlu0 %v2803_v26, %s2896_s9  ;;  %v2805_v35 = vpop.eup %2804 }
0x1e36   :  { %v1861_v43 = vadd.f32 1.0, %v2805_v35 }
0x1e38   :  { %2806 = vrcp.f32 %v1861_v43 }
0x1e42   :  { %v2807_v51 = vpop.eup %2806 }
0x1ea7   :  { %v1884_v62 = vpop.permute.xlu0 %1883 }
0x1ea8   :  { %v3387_v39 = vmul.f32 %v2807_v51, %v1884_v62 }
0x1eaa   :  { %v1896_v1 = vrot.slane %v3387_v39, 4 }
0x1eac   :  { %2332 = vmatmul.mubr.msk.f32.vlgmr.msra.gmra.mrb[16].mxu0 %vm75_vm0, %v1896_v1 }
0x1ead   :  { %2632 = vmatpush1.bf16.msra.mxu0 %v3238_v7  ;;  %2211 = vmatprep.mubr.f32.mxu0 %v2895_v0 }
0x1eae   :  { %2634 = vmatprep.subr.bf16.mxu0 %v3243_v14 }
0x1eb1   :  { %2636 = vmatpush1.bf16.msra.mxu0 %v3246_v18 }
0x1eb2   :  { %2638 = vmatprep.subr.bf16.mxu0 %v3253_v9 }
0x1eb5   :  { %2640 = vmatpush1.bf16.msra.mxu0 %v3255_v37 }
0x1eb6   :  { %2642 = vmatprep.subr.bf16.mxu0 %v3259_v55 }
0x1eb9   :  { %2644 = vmatpush1.bf16.msra.mxu0 %v3261_v56 }
0x1f7f   :  { %v1965_v44 = vpop.f32.mrb[16].mxu0 }
0x1f80   :  { %v1967_v48 = vpop.f32.mrb[17].mxu0  ;;  %v1972_v0 = vrot.slane %v1965_v44, 3 }
0x1f81   :  { %v1973_v20 = vrot.slane %v1967_v48, 3 }
0x1f82   :  { %v1976_v14 = vadd.f32 %v1972_v0, %v3311_v24 }
0x1f83   :  { %v1977_v19 = vadd.f32 %v1973_v20, %v3305_v15 }
0x1f84   :  { %v2333_v18 = vmul.f32 -1.442695, %v1976_v14 }
0x1f85   :  { %2808 = vtanh.f32 %v1977_v19  ;;  %v2334_v40 = vmul.f32 -1.442695, %v1977_v19 }
0x1f86   :  { %2810 = vpow2.f32 %v2333_v18 }
0x1f8f   :  { %v2809_v7 = vpop.eup %2808 }
0x1f90   :  { %1996 = vrot.lane.b32.xlu1 %v2809_v7, %s2896_s9  ;;  %v2811_v9 = vpop.eup %2810 }
0x1f91   :  { %v1984_v37 = vadd.f32 1.0, %v2811_v9 }
0x1f93   :  { %2812 = vrcp.f32 %v1984_v37 }
0x1f9d   :  { %v2813_v55 = vpop.eup %2812 }
0x1f9e   :  { %v1994_v34 = vmul.f32 %v2813_v55, %v1992_v33 }
0x2002   :  { %v1997_v32 = vpop.permute.xlu1 %1996 }
0x2003   :  { %v1999_v56 = vmul.f32 %v2813_v55, %v1997_v32 }
0x2005   :  { %2001 = vrot.lane.b32.xlu0 %v1999_v56, %s2896_s9 }
0x2077   :  { %v2002_v36 = vpop.permute.xlu0 %2001 }
0x2078   :  { %v2004_v25 = vadd.f32 %v2002_v36, %v1994_v34 }
0x207a   :  { %2814 = vtanh.f32 %v2004_v25  ;;  %v2116_v11 = vrot.slane %v2004_v25, 7 }
0x207b   :  { %2816 = vpow2.f32 %v2334_v40 }
0x2084   :  { %v2815_v38 = vpop.eup %2814 }
0x2085   :  { %2007 = vrot.lane.b32.xlu1 %v2815_v38, %s2896_s9  ;;  %v2817_v41 = vpop.eup %2816 }
0x2086   :  { %v1985_v6 = vadd.f32 1.0, %v2817_v41 }
0x2088   :  { %2818 = vrcp.f32 %v1985_v6 }
0x2092   :  { %v2819_v42 = vpop.eup %2818 }
0x20f7   :  { %v2008_v45 = vpop.permute.xlu1 %2007 }
0x20f8   :  { %v3404_v46 = vmul.f32 %v2819_v42, %v2008_v45 }
0x20fa   :  { %v2020_v47 = vrot.slane %v3404_v46, 5 }
0x20fc   :  { %2335 = vmatmul.mubr.msk.f32.vlgmr.msra.gmra.mrb[14].mxu1 %vm75_vm0, %v2020_v47 }
0x21cf   :  { %v2089_v49 = vpop.f32.mrb[14].mxu1 }
0x21d0   :  { %v2091_v54 = vpop.f32.mrb[15].mxu1  ;;  %v2096_v61 = vrot.slane %v2089_v49, 2 }
0x21d1   :  { %v2097_v57 = vrot.slane %v2091_v54, 2 }
0x21d2   :  { %v2100_v2 = vadd.f32 %v2096_v61, %v3311_v24 }
0x21d3   :  { %v2101_v59 = vadd.f32 %v2097_v57, %v3305_v15 }
0x21d4   :  { %v2336_v16 = vmul.f32 -1.442695, %v2100_v2 }
0x21d5   :  { %2820 = vtanh.f32 %v2101_v59  ;;  %v2337_v27 = vmul.f32 -1.442695, %v2101_v59 }
0x21d6   :  { %2822 = vpow2.f32 %v2336_v16 }
0x21df   :  { %v2821_v60 = vpop.eup %2820 }
0x21e0   :  { %2120 = vrot.lane.b32.xlu0 %v2821_v60, %s2896_s9  ;;  %v2823_v4 = vpop.eup %2822 }
0x21e1   :  { %v2108_v5 = vadd.f32 1.0, %v2823_v4 }
0x21e3   :  { %2824 = vrcp.f32 %v2108_v5 }
0x21ed   :  { %v2825_v50 = vpop.eup %2824 }
0x21ee   :  { %v2118_v12 = vmul.f32 %v2825_v50, %v2116_v11 }
0x2252   :  { %v2121_v8 = vpop.permute.xlu0 %2120 }
0x2253   :  { %v2123_v10 = vmul.f32 %v2825_v50, %v2121_v8 }
0x2255   :  { %2125 = vrot.lane.b32.xlu1 %v2123_v10, %s2896_s9 }
0x22c7   :  { %v2126_v17 = vpop.permute.xlu1 %2125 }
0x22c8   :  { %v2128_v21 = vadd.f32 %v2126_v17, %v2118_v12 }
0x22ca   :  { %2826 = vtanh.f32 %v2128_v21 }
0x22cb   :  { %2828 = vpow2.f32 %v2337_v27 }
0x22d4   :  { %v2827_v53 = vpop.eup %2826 }
0x22d5   :  { %2131 = vrot.lane.b32.xlu0 %v2827_v53, %s2896_s9  ;;  %v2829_v28 = vpop.eup %2828 }
0x22d6   :  { %v2109_v52 = vadd.f32 1.0, %v2829_v28 }
0x22d8   :  { %2830 = vrcp.f32 %v2109_v52 }
0x22e2   :  { %v2831_v29 = vpop.eup %2830 }
0x2347   :  { %v2132_v13 = vpop.permute.xlu0 %2131 }
0x2348   :  { %v2134_v22 = vmul.f32 %v2831_v29, %v2132_v13 }
0x234a   :  { %v2144_v26 = vrot.slane %v2134_v22, 6 }
0x234c   :  { %2338 = vmatmul.mubr.msk.f32.vlgmr.msra.gmra.mrb[18].mxu0 %vm75_vm0, %v2144_v26  ;;  %vm3487_vm0 = vcmask 1041152  }
0x241f   :  { %v2213_v30 = vpop.f32.mrb[18].mxu0 }
0x2420   :  { %v2215_v35 = vpop.f32.mrb[19].mxu0  ;;  %v2220_v1 = vrot.slane %v2213_v30, 1 }
0x2421   :  { %v2221_v43 = vrot.slane %v2215_v35, 1 }
0x2422   :  { %v2224_v44 = vadd.f32 %v2220_v1, %v3311_v24 }
0x2423   :  { %v2225_v51 = vadd.f32 %v2221_v43, %v3305_v15  ;;  %v2240_v15 = vrot.slane %v2128_v21, 7 }
0x2424   :  { %v2339_v48 = vmul.f32 -1.442695, %v2224_v44 }
0x2425   :  { %2832 = vtanh.f32 %v2225_v51  ;;  %v2340_v34 = vmul.f32 -1.442695, %v2225_v51 }
0x2426   :  { %2834 = vpow2.f32 %v2339_v48 }
0x242f   :  { %v2833_v62 = vpop.eup %2832 }
0x2430   :  { %2244 = vrot.lane.b32.xlu1 %v2833_v62, %s2896_s9  ;;  %v2835_v20 = vpop.eup %2834 }
0x2431   :  { %v2232_v19 = vadd.f32 1.0, %v2835_v20 }
0x2433   :  { %2836 = vrcp.f32 %v2232_v19 }
0x243d   :  { %v2837_v7 = vpop.eup %2836 }
0x243e   :  { %v2242_v24 = vmul.f32 %v2837_v7, %v2240_v15 }
0x24a2   :  { %v2245_v0 = vpop.permute.xlu1 %2244 }
0x24a3   :  { %v2247_v14 = vmul.f32 %v2837_v7, %v2245_v0 }
0x24a5   :  { %2249 = vrot.lane.b32.xlu0 %v2247_v14, %s2896_s9 }
0x24a9   :  { %1393 = vrot.lane.b32.xlu0 %v3316_v31, %s2897_s1 }
0x24ad   :  { %1516 = vrot.lane.b32.xlu0 %v3334_v3, %s2897_s1 }
0x24b1   :  { %1640 = vrot.lane.b32.xlu0 %v3352_v58, %s2897_s1 }
0x24b5   :  { %1764 = vrot.lane.b32.xlu0 %v3370_v63, %s2897_s1 }
0x24b9   :  { %1888 = vrot.lane.b32.xlu0 %v3387_v39, %s2897_s1 }
0x24bd   :  { %2012 = vrot.lane.b32.xlu0 %v3404_v46, %s2897_s1 }
0x24c1   :  { %2136 = vrot.lane.b32.xlu0 %v2134_v22, %s2897_s1 }
0x2517   :  { %v2250_v18 = vpop.permute.xlu0 %2249 }
0x2518   :  { %v2252_v9 = vadd.f32 %v2250_v18, %v2242_v24 }
0x251a   :  { %2838 = vtanh.f32 %v2252_v9 }
0x251b   :  { %v1394_v37 = vpop.permute.xlu0 %1393  ;;  %2840 = vpow2.f32 %v2340_v34 }
0x251c   :  { %1396 = vst.msk [vmem:[#allocation6] sm:$0x1] %vm258_vm2, %v1394_v37  ;;  %vm3488_vm2 = vcmask 522502  }
0x251f   :  { %v1517_v55 = vpop.permute.xlu0 %1516 }
0x2520   :  { %1519 = vst.msk [vmem:[#allocation6] sm:$0x2] %vm384_vm4, %v1517_v55  ;;  %vm3489_vm4 = vcmask 1043202  }
0x2523   :  { %v1641_v32 = vpop.permute.xlu0 %1640 }
0x2524   :  { %v2839_v56 = vpop.eup %2838  ;;  %1643 = vst.msk [vmem:[#allocation6] sm:$0x4] %vm511_vm6, %v1641_v32  ;;  %vm3490_vm6 = vcmask 521477  }
0x2525   :  { %2255 = vrot.lane.b32.xlu1 %v2839_v56, %s2896_s9 }
0x2527   :  { %v1765_v33 = vpop.permute.xlu0 %1764 }
0x2528   :  { %1767 = vst.msk [vmem:[#allocation6] sm:$0x8] %vm638_vm8, %v1765_v33  ;;  %vm2269_vm8 = vcmask 261120  }
0x2529   :  { %1397 = vrot.lane.b32.xlu1 %v3316_v31, %s2896_s9  ;;  %v2841_v31 = vpop.eup %2840 }
0x252a   :  { %v2233_v36 = vadd.f32 1.0, %v2841_v31 }
0x252c   :  { %2842 = vrcp.f32 %v2233_v36 }
0x252d   :  { %1520 = vrot.lane.b32.xlu1 %v3334_v3, %s2896_s9  ;;  %v1889_v3 = vpop.permute.xlu0 %1888 }
0x2531   :  { %1644 = vrot.lane.b32.xlu1 %v3352_v58, %s2896_s9  ;;  %v2013_v40 = vpop.permute.xlu0 %2012 }
0x2535   :  { %1768 = vrot.lane.b32.xlu1 %v3370_v63, %s2896_s9  ;;  %v2137_v41 = vpop.permute.xlu0 %2136 }
0x2536   :  { %v2843_v25 = vpop.eup %2842 }
0x2539   :  { %1892 = vrot.lane.b32.xlu1 %v3387_v39, %s2896_s9 }
0x253d   :  { %2016 = vrot.lane.b32.xlu1 %v3404_v46, %s2896_s9 }
0x2541   :  { %2140 = vrot.lane.b32.xlu1 %v2134_v22, %s2896_s9 }
0x2597   :  { %v2256_v38 = vpop.permute.xlu1 %2255 }
0x2598   :  { %v2258_v58 = vmul.f32 %v2843_v25, %v2256_v38 }
0x259a   :  { %2264 = vrot.lane.b32.xlu1 %v2258_v58, %s2896_s9  ;;  %2260 = vrot.lane.b32.xlu0 %v2258_v58, %s2897_s1 }
0x259b   :  { %v1398_v63 = vpop.permute.xlu1 %1397 }
0x259c   :  { %1400 = vst.msk [vmem:[#allocation6 + $0x7] sm:$0x1] %vm3487_vm0, %v1398_v63 }
0x259e   :  { %2273 = vrot.lane.b32.xlu0 %v3291_v23, %s2897_s1 }
0x259f   :  { %v1521_v39 = vpop.permute.xlu1 %1520 }
0x25a0   :  { %1523 = vst.msk [vmem:[#allocation6 + $0x5] sm:$0x2] %vm392_vm5, %v1521_v39  ;;  %vm3491_vm5 = vcmask 523527  }
0x25a1   :  { %2139 = vst.msk [vmem:[#allocation6] sm:$0x40] %vm3488_vm2, %v2137_v41 }
0x25a3   :  { %v1645_v6 = vpop.permute.xlu1 %1644 }
0x25a4   :  { %1647 = vst.msk [vmem:[#allocation6 + $0x3] sm:$0x4] %vm3489_vm4, %v1645_v6 }
0x25a5   :  { %2015 = vst.msk [vmem:[#allocation6] sm:$0x20] %vm3490_vm6, %v2013_v40 }
0x25a7   :  { %v1769_v42 = vpop.permute.xlu1 %1768 }
0x25a8   :  { %1771 = vst.msk [vmem:[#allocation6 + $0x1] sm:$0x8] %vm646_vm12, %v1769_v42  ;;  %vm2276_vm12 = vcmask 785920  }
0x25a9   :  { %1891 = vst.msk [vmem:[#allocation6] sm:$0x10] %vm765_vm1, %v1889_v3 }
0x25ab   :  { %v1893_v45 = vpop.permute.xlu1 %1892 }
0x25ac   :  { %1895 = vst.msk [vmem:[#allocation6 - $0x1] sm:$0x10] %vm773_vm10, %v1893_v45 }
0x25af   :  { %v2017_v46 = vpop.permute.xlu1 %2016 }
0x25b0   :  { %2019 = vst.msk [vmem:[#allocation6 - $0x3] sm:$0x20] %vm900_vm9, %v2017_v46 }
0x25b3   :  { %v2141_v47 = vpop.permute.xlu1 %2140 }
0x25b4   :  { %2143 = vst.msk [vmem:[#allocation6 - $0x5] sm:$0x40] %vm1027_vm13, %v2141_v47 }
0x260c   :  { %v2265_v49 = vpop.permute.xlu1 %2264  ;;  %v2261_v54 = vpop.permute.xlu0 %2260 }
0x260d   :  { %2267 = vst.msk [vmem:[#allocation6 - $0x7] sm:$0x80] %vm1154_vm11, %v2265_v49 }
0x260e   :  { %2263 = vst.msk [vmem:[#allocation6] sm:$0x80] %vm3491_vm5, %v2261_v54 }
0x260f   :  { %2270 = vst.msk [vmem:[#allocation6] sm:$0xff] %vm2269_vm8, %v3291_v23 }
0x2610   :  { %v2274_v57 = vpop.permute.xlu0 %2273 }
0x2611   :  { %2277 = vst.msk [vmem:[#allocation6] sm:$0xff] %vm2276_vm12, %v2274_v57 }
0x2612   :  { %2877 = shalt.err (!%p2874_p12)
}
0x2613   :  { %s2878_s15 = scalar_lea.hbm %s3481_s3, 128 }
0x2614   :  { %p2879_p13 = scmp.ne.s32.totalorder %s3481_s3, %s2878_s15  ;;  %p2882_p0 = scmp.lt.u32.totalorder %s2878_s15, %s3481_s3 }
0x2616   :  { %p2884_p1 = pnand %p2882_p0, %p2879_p13 }
0x2618   :  { %2887 = shalt.err (!%p2884_p1)
}
0x2619   :  { %2287 = dma.vmem_to_hbm [thread:$0]  %s2285_s11, 128, %s3481_s3, [#allocation5]  }
0x261a   :  { %2890 = dma.done.wait [#allocation5], 128  }
0x261b   :  { %2891 = vsyncadd [#allocation5], 4294967168 }
0x261c   :  { %2291 = vsyncpa [#allocation4], 1 }
0x261d   :  { %2292 = vsyncpa [#allocation5], 1 }

</bundles_post_ra>
